<compile_context>
chip_gen: v6e
topology: v6e:2x2x1
jax: 0.10.0
libtpu: 0.0.40
codegen_flags: <defaults>
</compile_context>

<pallas_src>
import functools

import jax
import jax.numpy as jnp
from jax.experimental import pallas as pl
from jax.experimental.pallas import tpu as pltpu

BN_EPS = 1e-3        # scvi FCLayers: nn.BatchNorm1d(n_hidden, momentum=0.01, eps=0.001)
_NEG_BIAS = -1e9     # bias for padded softmax columns -> exp(.) == 0


def _round_up(x, m):
    return ((x + m - 1) // m) * m


# ----------------------------------------------------------------------------- kernel


def _make_decoder_kernel(*, include_r, true_b, b_pad, tn):
    """Grid = (2, num_gene_tiles); both axes 'arbitrary' (scratch carries state).

    Phase 0: stream heads, tiled px_dropout / px_r writes, online softmax stats.
    Phase 1: recompute scale logits, normalize, tiled px_scale / px_rate writes.
    """
    ka = 2 if include_r else 1   # columns per tile in the aux slab: [r|drop] or [drop]

    def kernel(z_ref, lib_ref, w0_ref, b0_ref, gamma_ref, beta_ref,
               ws_ref, bs_ref, wa_ref, ba_ref,
               scale_ref, rate_ref, drop_ref, *rest):
        if include_r:
            r_ref, h_sc, m_sc, l_sc = rest
        else:
            r_ref = None
            h_sc, m_sc, l_sc = rest

        p = pl.program_id(0)      # phase
        j = pl.program_id(1)      # gene tile

        # ---- FCLayers (Linear -> BN(train stats) -> ReLU), computed once -----------
        @pl.when((p == 0) & (j == 0))
        def _init():
            zc = z_ref[...].astype(w0_ref.dtype)
            h = jnp.dot(zc, w0_ref[...],
                        preferred_element_type=jnp.float32) + b0_ref[...]
            if b_pad != true_b:
                # padded batch rows must not pollute the BatchNorm statistics
                rows = jax.lax.broadcasted_iota(jnp.int32, (b_pad, 1), 0)
                rmask = (rows < true_b).astype(jnp.float32)
                mean = jnp.sum(h * rmask, axis=0, keepdims=True) / true_b
                cent = h - mean
                var = jnp.sum(cent * cent * rmask, axis=0, keepdims=True) / true_b
            else:
                rmask = None
                mean = jnp.mean(h, axis=0, keepdims=True)
                cent = h - mean
                var = jnp.mean(cent * cent, axis=0, keepdims=True)   # biased (PyTorch)
            hbn = cent * jax.lax.rsqrt(var + BN_EPS) * gamma_ref[...] + beta_ref[...]
            hr = jnp.maximum(hbn, 0.0)                               # ReLU; dropout p=0
            if rmask is not None:
                hr = hr * rmask                                      # keep padded rows inert
            h_sc[...] = hr                                           # f32 cache
            m_sc[...] = jnp.full_like(m_sc, -1e30)
            l_sc[...] = jnp.zeros_like(l_sc)

        hq = h_sc[...].astype(ws_ref.dtype)
        # Scale-head logits are needed in both phases; phase 1 recomputes them instead of
        # keeping a (B, n_genes) resident block, so VMEM stays O(tile).
        lg_s = jnp.dot(hq, ws_ref[...],
                       preferred_element_type=jnp.float32) + bs_ref[...]

        @pl.when(p == 0)
        def _stream_heads():
            # online softmax statistics (hidden under the weight-slab DMA)
            m_new = jnp.maximum(m_sc[...], jnp.max(lg_s, axis=-1, keepdims=True))
            l_sc[...] = (l_sc[...] * jnp.exp(m_sc[...] - m_new)
                         + jnp.sum(jnp.exp(lg_s - m_new), axis=-1, keepdims=True))
            m_sc[...] = m_new
            # r / dropout heads: one wide MXU dot on the [r|drop] slab, tiled stores
            lg_a = jnp.dot(hq, wa_ref[...],
                           preferred_element_type=jnp.float32) + ba_ref[...]
            drop_ref[...] = lg_a[:, (ka - 1) * tn:ka * tn].astype(drop_ref.dtype)
            if include_r:
                r_ref[...] = lg_a[:, 0:tn].astype(r_ref.dtype)

        @pl.when(p == 1)
        def _normalize():
            inv_l = 1.0 / l_sc[...]                    # exact divide, only (B,1) values
            sc = jnp.exp(lg_s - m_sc[...]) * inv_l
            scale_ref[...] = sc.astype(scale_ref.dtype)
            rate_ref[...] = (jnp.exp(lib_ref[...]) * sc).astype(rate_ref.dtype)

    return kernel


# ----------------------------------------------------------------------------- params


def prepare_decoder_params(params, dispersion, *, tn=1024, param_dtype=jnp.bfloat16):
    """One-time weight repack (hoisted out of the per-call forward path).

    Pads the gene axis UP to a multiple of tn (padded softmax columns get a -1e9 bias),
    transposes all weights to (n_hidden, genes) layout and interleaves the [r|drop]
    heads per gene tile so one BlockSpec streams one contiguous lane-dense slab.
    """
    include_r = dispersion == "gene-cell"
    n_hidden, n_in = params["w0"].shape
    n_out = params["ws"].shape[0]

    tn = max(128, (int(tn) // 128) * 128)
    tn = min(tn, _round_up(n_out, 128))          # don't over-pad tiny gene counts
    n_out_pad = _round_up(n_out, tn)             # pad genes UP, never shrink the tile
    num_tiles = n_out_pad // tn
    pad = n_out_pad - n_out
    ka = 2 if include_r else 1

    w0 = params["w0"].T.astype(param_dtype)                        # (n_in, n_hidden)
    b0 = params["b0"].reshape(1, -1).astype(jnp.float32)
    gamma = params["bn_gamma"].reshape(1, -1).astype(jnp.float32)
    beta = params["bn_beta"].reshape(1, -1).astype(jnp.float32)

    ws = jnp.pad(params["ws"].T.astype(param_dtype), ((0, 0), (0, pad)))
    bs = jnp.pad(params["bs"].astype(jnp.float32), (0, pad),
                 constant_values=_NEG_BIAS).reshape(1, -1)

    aux_heads = ([("wr", "br")] if include_r else []) + [("wd", "bd")]
    w_t, b_t = [], []
    for wn, bn in aux_heads:
        wt = jnp.pad(params[wn].T.astype(param_dtype), ((0, 0), (0, pad)))
        w_t.append(wt.reshape(n_hidden, num_tiles, tn))
        bt = jnp.pad(params[bn].astype(jnp.float32), (0, pad))
        b_t.append(bt.reshape(num_tiles, tn))
    wa = jnp.stack(w_t, axis=2).reshape(n_hidden, num_tiles * ka * tn)
    ba = jnp.stack(b_t, axis=1).reshape(1, num_tiles * ka * tn)

    return {
        "w0": w0, "b0": b0, "gamma": gamma, "beta": beta,
        "ws": ws, "bs": bs, "wa": wa, "ba": ba,
        "meta": {
            "n_in": int(n_in), "n_hidden": int(n_hidden), "n_out": int(n_out),
            "n_out_pad": int(n_out_pad), "tn": int(tn), "num_tiles": int(num_tiles),
            "include_r": include_r, "param_dtype": param_dtype,
        },
    }


# ----------------------------------------------------------------------------- wrapper


def decoder_scvi_forward(packed, z, library, *cat_list, out_dtype=jnp.float32):
    """DecoderSCVI forward. Returns (px_scale, px_r, px_rate, px_dropout);
    px_r is None unless dispersion == 'gene-cell' (matches the PyTorch module).
    cat_list is ignored (module configured with n_cat_list=None)."""
    del cat_list
    meta = packed["meta"]
    n_in, n_hidden = meta["n_in"], meta["n_hidden"]
    n_out, n_out_pad = meta["n_out"], meta["n_out_pad"]
    tn, T = meta["tn"], meta["num_tiles"]
    include_r = meta["include_r"]
    ka = 2 if include_r else 1

    B = z.shape[0]
    b_pad = _round_up(max(B, 8), 8)
    z_p = jnp.pad(z.astype(jnp.float32), ((0, b_pad - B), (0, 0)))
    lib_p = jnp.pad(library.astype(jnp.float32), ((0, b_pad - B), (0, 0)))

    kernel = _make_decoder_kernel(include_r=include_r, true_b=B, b_pad=b_pad, tn=tn)

    const = lambda p, j: (0, 0)
    # streamed every step (phase 1 recomputes the scale logits)
    stream = lambda p, j: (0, j)
    # streamed in phase 0; pinned to the last block in phase 1 (no re-fetch / no
    # spurious output writeback, because the block index stays constant)
    stream_p0 = lambda p, j: (0, j * (1 - p) + (T - 1) * p)
    # written only in phase 1; pinned to block 0 during phase 0 (no writeback there)
    write_p1 = lambda p, j: (0, j * p)

    in_specs = [
        pl.BlockSpec((b_pad, n_in), const),        # z (resident)
        pl.BlockSpec((b_pad, 1), const),           # library (resident)
        pl.BlockSpec((n_in, n_hidden), const),     # W0 (resident)
        pl.BlockSpec((1, n_hidden), const),        # b0
        pl.BlockSpec((1, n_hidden), const),        # bn gamma
        pl.BlockSpec((1, n_hidden), const),        # bn beta
        pl.BlockSpec((n_hidden, tn), stream),      # scale weights (both phases)
        pl.BlockSpec((1, tn), stream),             # scale bias
        pl.BlockSpec((n_hidden, ka * tn), stream_p0),  # [r|drop] weight slab (phase 0)
        pl.BlockSpec((1, ka * tn), stream_p0),         # [r|drop] bias slab
    ]

    out_shapes = [jax.ShapeDtypeStruct((b_pad, n_out_pad), out_dtype),   # px_scale
                  jax.ShapeDtypeStruct((b_pad, n_out_pad), out_dtype),   # px_rate
                  jax.ShapeDtypeStruct((b_pad, n_out_pad), out_dtype)]   # px_dropout
    out_specs = [pl.BlockSpec((b_pad, tn), write_p1),
                 pl.BlockSpec((b_pad, tn), write_p1),
                 pl.BlockSpec((b_pad, tn), stream_p0)]
    if include_r:
        out_shapes.append(jax.ShapeDtypeStruct((b_pad, n_out_pad), out_dtype))
        out_specs.append(pl.BlockSpec((b_pad, tn), stream_p0))

    # VMEM budget from actual buffer math (resident blocks + double-buffered streams
    # + double-buffered tiled outputs + scratch), with headroom.
    pdt = jnp.dtype(meta["param_dtype"]).itemsize
    odt = jnp.dtype(out_dtype).itemsize
    n_outs = 4 if include_r else 3
    vmem_est = (
        b_pad * n_in * 4 + b_pad * 4
        + n_in * n_hidden * pdt + 3 * n_hidden * 4
        + 2 * (n_hidden * tn * pdt + tn * 4)
        + 2 * (n_hidden * ka * tn * pdt + ka * tn * 4)
        + 2 * n_outs * b_pad * tn * odt
        + b_pad * n_hidden * 4 + 2 * b_pad * 4
    )
    vmem_limit = int(min(100 << 20, max(32 << 20, vmem_est + (8 << 20))))

    outs = pl.pallas_call(
        kernel,
        out_shape=tuple(out_shapes),
        grid=(2, T),
        in_specs=in_specs,
        out_specs=tuple(out_specs),
        scratch_shapes=[pltpu.VMEM((b_pad, n_hidden), jnp.float32),   # cached h
                        pltpu.VMEM((b_pad, 1), jnp.float32),          # running row max
                        pltpu.VMEM((b_pad, 1), jnp.float32)],         # running sum-of-exp
        compiler_params=pltpu.CompilerParams(
            dimension_semantics=("arbitrary", "arbitrary"),  # both axes carry scratch state
            vmem_limit_bytes=vmem_limit,
        ),
    )(z_p, lib_p, packed["w0"], packed["b0"], packed["gamma"], packed["beta"],
      packed["ws"], packed["bs"], packed["wa"], packed["ba"])

    if include_r:
        px_scale, px_rate, px_dropout, px_r = outs
        px_r = px_r[:B, :n_out]
    else:
        px_scale, px_rate, px_dropout = outs
        px_r = None
    return (px_scale[:B, :n_out], px_r, px_rate[:B, :n_out], px_dropout[:B, :n_out])


# ----------------------------------------------------------------------------- reference


def decoder_scvi_reference(params, dispersion, z, library, param_dtype=jnp.float32):
    """Pure-JAX reference mirroring the kernel's dtype choices."""
    h = jnp.dot(z.astype(param_dtype), params["w0"].T.astype(param_dtype),
                preferred_element_type=jnp.float32) + params["b0"][None, :]
    mean = jnp.mean(h, axis=0, keepdims=True)
    var = jnp.mean((h - mean) ** 2, axis=0, keepdims=True)
    h = (h - mean) * jax.lax.rsqrt(var + BN_EPS)
    h = h * params["bn_gamma"][None, :] + params["bn_beta"][None, :]
    h = jnp.maximum(h, 0.0).astype(param_dtype)

    def lin(wn, bn):
        return jnp.dot(h, params[wn].T.astype(param_dtype),
                       preferred_element_type=jnp.float32) + params[bn][None, :]

    logits = lin("ws", "bs")
    px_scale = jax.nn.softmax(logits, axis=-1)
    px_dropout = lin("wd", "bd")
    px_rate = jnp.exp(library) * px_scale
    px_r = lin("wr", "br") if dispersion == "gene-cell" else None
    return px_scale, px_r, px_rate, px_dropout


def init_params(key, n_input, n_hidden, n_output):
    """PyTorch-Linear-style init: U(-1/sqrt(fan_in), 1/sqrt(fan_in))."""
    ks = jax.random.split(key, 8)

    def linear(kw, kb, fan_out, fan_in):
        bound = 1.0 / jnp.sqrt(jnp.float32(fan_in))
        w = jax.random.uniform(kw, (fan_out, fan_in), jnp.float32, -bound, bound)
        b = jax.random.uniform(kb, (fan_out,), jnp.float32, -bound, bound)
        return w, b

    w0, b0 = linear(ks[0], ks[1], n_hidden, n_input)
    ws, bs = linear(ks[2], ks[3], n_output, n_hidden)
    wr, br = linear(ks[4], ks[5], n_output, n_hidden)
    wd, bd = linear(ks[6], ks[7], n_output, n_hidden)
    return {
        "w0": w0, "b0": b0,
        "bn_gamma": jnp.ones((n_hidden,), jnp.float32),
        "bn_beta": jnp.zeros((n_hidden,), jnp.float32),
        "ws": ws, "bs": bs, "wr": wr, "br": br, "wd": wd, "bd": bd,
    }


def _max_rel_err(a, b):
    a = jnp.asarray(a, jnp.float32)
    b = jnp.asarray(b, jnp.float32)
    return float(jnp.max(jnp.abs(a - b)) / (jnp.max(jnp.abs(b)) + 1e-8))


if __name__ == "__main__":
    ks = jax.random.split(jax.random.PRNGKey(0), 6)

    # ---- run 1: f32 params/outputs, dispersion='gene-cell', unaligned B=6 / n_out=200,
    # ----        tn=128 -> 2 gene tiles (exercises the two-phase grid) ----------------
    B, n_input, n_hidden, n_output = 6, 16, 128, 200
    params = init_params(ks[0], n_input, n_hidden, n_output)
    z = jax.random.normal(ks[1], (B, n_input), jnp.float32)
    library = jax.random.normal(ks[2], (B, 1), jnp.float32)

    packed = prepare_decoder_params(params, "gene-cell", tn=128,
                                    param_dtype=jnp.float32)
    fwd = jax.jit(functools.partial(decoder_scvi_forward, packed,
                                    out_dtype=jnp.float32))
    px_scale, px_r, px_rate, px_dropout = fwd(z, library)
    jax.block_until_ready((px_scale, px_r, px_rate, px_dropout))

    rs, rr, rrate, rdrop = decoder_scvi_reference(params, "gene-cell", z, library)
    assert px_scale.shape == (B, n_output) and px_r.shape == (B, n_output)
    assert px_rate.shape == (B, n_output) and px_dropout.shape == (B, n_output)
    assert bool(jnp.all(jnp.abs(jnp.sum(px_scale, axis=-1) - 1.0) < 5e-3))
    assert _max_rel_err(px_scale, rs) < 2e-2
    assert _max_rel_err(px_r, rr) < 2e-2
    assert _max_rel_err(px_rate, rrate) < 2e-2
    assert _max_rel_err(px_dropout, rdrop) < 2e-2

    # ---- run 2: bf16 weights + bf16 outputs, dispersion='gene' (px_r branch removed),
    # ----        n_out=300 padded UP to 2 tiles of tn=256 ------------------------------
    B2, n_out2 = 8, 300
    params2 = init_params(ks[3], n_input, n_hidden, n_out2)
    z2 = jax.random.normal(ks[4], (B2, n_input), jnp.float32)
    lib2 = jax.random.normal(ks[5], (B2, 1), jnp.float32)

    packed2 = prepare_decoder_params(params2, "gene", tn=256,
                                     param_dtype=jnp.bfloat16)
    fwd2 = jax.jit(functools.partial(decoder_scvi_forward, packed2,
                                     out_dtype=jnp.bfloat16))
    s2, r2, rate2, drop2 = fwd2(z2, lib2)
    jax.block_until_ready((s2, rate2, drop2))
    assert r2 is None
    rs2, _, rrate2, rdrop2 = decoder_scvi_reference(params2, "gene", z2, lib2,
                                                    param_dtype=jnp.bfloat16)
    assert bool(jnp.all(jnp.abs(jnp.sum(jnp.asarray(s2, jnp.float32), axis=-1) - 1.0)
                        < 1e-2))
    assert _max_rel_err(s2, rs2) < 6e-2
    assert _max_rel_err(rate2, rrate2) < 6e-2
    assert _max_rel_err(drop2, rdrop2) < 6e-2

    print("KERNEL_OK")
</pallas_src>

<mosaic_0001>
module attributes {stable_mosaic.version = 11 : i64} {
  func.func @kernel(%arg0: i32, %arg1: i32, %arg2: memref<8x16xf32, #tpu.memory_space<vmem>>, %arg3: memref<8x1xf32, #tpu.memory_space<vmem>>, %arg4: memref<16x128xf32, #tpu.memory_space<vmem>>, %arg5: memref<1x128xf32, #tpu.memory_space<vmem>>, %arg6: memref<1x128xf32, #tpu.memory_space<vmem>>, %arg7: memref<1x128xf32, #tpu.memory_space<vmem>>, %arg8: memref<128x128xf32, #tpu.memory_space<vmem>>, %arg9: memref<1x128xf32, #tpu.memory_space<vmem>>, %arg10: memref<128x256xf32, #tpu.memory_space<vmem>>, %arg11: memref<1x256xf32, #tpu.memory_space<vmem>>, %arg12: memref<8x128xf32, #tpu.memory_space<vmem>>, %arg13: memref<8x128xf32, #tpu.memory_space<vmem>>, %arg14: memref<8x128xf32, #tpu.memory_space<vmem>>, %arg15: memref<8x128xf32, #tpu.memory_space<vmem>>, %arg16: memref<8x128xf32, #tpu.memory_space<vmem>>, %arg17: memref<8x1xf32, #tpu.memory_space<vmem>>, %arg18: memref<8x1xf32, #tpu.memory_space<vmem>>) attributes {dimension_semantics = [#tpu.dimension_semantics<arbitrary>, #tpu.dimension_semantics<arbitrary>], iteration_bounds = array<i64: 2, 2>, scalar_prefetch = 0 : i64, scratch_operands = 3 : i64, tpu.core_type = #tpu.core_type<tc>, window_params = [{pipeline_mode = #tpu.pipeline_mode<synchronous>, transform_indices = @transform_0, window_bounds = array<i64: 8, 16>}, {pipeline_mode = #tpu.pipeline_mode<synchronous>, transform_indices = @transform_1, window_bounds = array<i64: 8, 1>}, {pipeline_mode = #tpu.pipeline_mode<synchronous>, transform_indices = @transform_2, window_bounds = array<i64: 16, 128>}, {pipeline_mode = #tpu.pipeline_mode<synchronous>, transform_indices = @transform_3, window_bounds = array<i64: 1, 128>}, {pipeline_mode = #tpu.pipeline_mode<synchronous>, transform_indices = @transform_4, window_bounds = array<i64: 1, 128>}, {pipeline_mode = #tpu.pipeline_mode<synchronous>, transform_indices = @transform_5, window_bounds = array<i64: 1, 128>}, {transform_indices = @transform_6, window_bounds = array<i64: 128, 128>}, {transform_indices = @transform_7, window_bounds = array<i64: 1, 128>}, {transform_indices = @transform_8, window_bounds = array<i64: 128, 256>}, {transform_indices = @transform_9, window_bounds = array<i64: 1, 256>}, {transform_indices = @transform_10, window_bounds = array<i64: 8, 128>}, {transform_indices = @transform_11, window_bounds = array<i64: 8, 128>}, {transform_indices = @transform_12, window_bounds = array<i64: 8, 128>}, {transform_indices = @transform_13, window_bounds = array<i64: 8, 128>}]} {
    %c0_i32 = arith.constant 0 : i32
    %0 = arith.cmpi eq, %arg0, %c0_i32 : i32
    %c0_i32_0 = arith.constant 0 : i32
    %1 = arith.cmpi eq, %arg1, %c0_i32_0 : i32
    %2 = arith.andi %0, %1 : i1
    %3 = arith.extui %2 : i1 to i32
    %c0_i32_1 = arith.constant 0 : i32
    %4 = arith.cmpi ne, %3, %c0_i32_1 : i32
    scf.if %4 {
      %c0_10 = arith.constant 0 : index
      %c0_11 = arith.constant 0 : index
      %17 = vector.load %arg2[%c0_10, %c0_11] : memref<8x16xf32, #tpu.memory_space<vmem>>, vector<8x16xf32>
      %c0_12 = arith.constant 0 : index
      %c0_13 = arith.constant 0 : index
      %18 = vector.load %arg4[%c0_12, %c0_13] : memref<16x128xf32, #tpu.memory_space<vmem>>, vector<16x128xf32>
      %cst_14 = arith.constant dense<0.000000e+00> : vector<8x128xf32>
      %19 = tpu.matmul %17, %18, %cst_14 {dimension_numbers = #tpu.dot_dimension_numbers<[1], [0], [0], [1], [0, 0, 1, 1], [], []>} : vector<8x16xf32>, vector<16x128xf32>, vector<8x128xf32> -> vector<8x128xf32>
      %c0_15 = arith.constant 0 : index
      %c0_16 = arith.constant 0 : index
      %20 = vector.load %arg5[%c0_15, %c0_16] : memref<1x128xf32, #tpu.memory_space<vmem>>, vector<1x128xf32>
      %21 = vector.broadcast %20 : vector<1x128xf32> to vector<8x128xf32>
      %22 = arith.addf %19, %21 : vector<8x128xf32>
      %23 = tpu.iota {dimensions = array<i32: 0>} : vector<8x1xi32>
      %c6_i32 = arith.constant 6 : i32
      %24 = vector.broadcast %c6_i32 : i32 to vector<8x1xi32>
      %25 = arith.cmpi slt, %23, %24 : vector<8x1xi32>
      %26 = arith.extui %25 : vector<8x1xi1> to vector<8x1xi32>
      %27 = arith.sitofp %26 : vector<8x1xi32> to vector<8x1xf32>
      %28 = vector.broadcast %27 : vector<8x1xf32> to vector<8x128xf32>
      %29 = arith.mulf %22, %28 : vector<8x128xf32>
      %cst_17 = arith.constant dense<0.000000e+00> : vector<128xf32>
      %30 = vector.multi_reduction <add>, %29, %cst_17 [0] : vector<8x128xf32> to vector<128xf32>
      %31 = vector.shape_cast %30 : vector<128xf32> to vector<1x128xf32>
      %cst_18 = arith.constant 6.000000e+00 : f32
      %32 = vector.broadcast %cst_18 : f32 to vector<1x128xf32>
      %33 = arith.divf %31, %32 : vector<1x128xf32>
      %34 = vector.broadcast %33 : vector<1x128xf32> to vector<8x128xf32>
      %35 = arith.subf %22, %34 : vector<8x128xf32>
      %36 = arith.mulf %35, %35 : vector<8x128xf32>
      %37 = vector.broadcast %27 : vector<8x1xf32> to vector<8x128xf32>
      %38 = arith.mulf %36, %37 : vector<8x128xf32>
      %cst_19 = arith.constant dense<0.000000e+00> : vector<128xf32>
      %39 = vector.multi_reduction <add>, %38, %cst_19 [0] : vector<8x128xf32> to vector<128xf32>
      %40 = vector.shape_cast %39 : vector<128xf32> to vector<1x128xf32>
      %cst_20 = arith.constant 6.000000e+00 : f32
      %41 = vector.broadcast %cst_20 : f32 to vector<1x128xf32>
      %42 = arith.divf %40, %41 : vector<1x128xf32>
      %cst_21 = arith.constant 1.000000e-03 : f32
      %43 = vector.broadcast %cst_21 : f32 to vector<1x128xf32>
      %44 = arith.addf %42, %43 : vector<1x128xf32>
      %45 = math.rsqrt %44 : vector<1x128xf32>
      %46 = vector.broadcast %45 : vector<1x128xf32> to vector<8x128xf32>
      %47 = arith.mulf %35, %46 : vector<8x128xf32>
      %c0_22 = arith.constant 0 : index
      %c0_23 = arith.constant 0 : index
      %48 = vector.load %arg6[%c0_22, %c0_23] : memref<1x128xf32, #tpu.memory_space<vmem>>, vector<1x128xf32>
      %49 = vector.broadcast %48 : vector<1x128xf32> to vector<8x128xf32>
      %50 = arith.mulf %47, %49 : vector<8x128xf32>
      %c0_24 = arith.constant 0 : index
      %c0_25 = arith.constant 0 : index
      %51 = vector.load %arg7[%c0_24, %c0_25] : memref<1x128xf32, #tpu.memory_space<vmem>>, vector<1x128xf32>
      %52 = vector.broadcast %51 : vector<1x128xf32> to vector<8x128xf32>
      %53 = arith.addf %50, %52 : vector<8x128xf32>
      %cst_26 = arith.constant 0.000000e+00 : f32
      %54 = vector.broadcast %cst_26 : f32 to vector<8x128xf32>
      %55 = arith.maximumf %53, %54 : vector<8x128xf32>
      %56 = vector.broadcast %27 : vector<8x1xf32> to vector<8x128xf32>
      %57 = arith.mulf %55, %56 : vector<8x128xf32>
      %c0_27 = arith.constant 0 : index
      %c0_28 = arith.constant 0 : index
      %58 = vector.load %arg16[%c0_27, %c0_28] : memref<8x128xf32, #tpu.memory_space<vmem>>, vector<8x128xf32>
      tpu.vector_store %arg16[%c0_27, %c0_28], %57 {strides = array<i32>} : memref<8x128xf32, #tpu.memory_space<vmem>>, vector<8x128xf32>,
      %cst_29 = arith.constant -1.000000e+30 : f32
      %59 = vector.broadcast %cst_29 : f32 to vector<8x1xf32>
      %c0_30 = arith.constant 0 : index
      %c0_31 = arith.constant 0 : index
      %60 = vector.load %arg17[%c0_30, %c0_31] : memref<8x1xf32, #tpu.memory_space<vmem>>, vector<8x1xf32>
      tpu.vector_store %arg17[%c0_30, %c0_31], %59 {strides = array<i32>} : memref<8x1xf32, #tpu.memory_space<vmem>>, vector<8x1xf32>,
      %cst_32 = arith.constant 0.000000e+00 : f32
      %61 = vector.broadcast %cst_32 : f32 to vector<8x1xf32>
      %c0_33 = arith.constant 0 : index
      %c0_34 = arith.constant 0 : index
      %62 = vector.load %arg18[%c0_33, %c0_34] : memref<8x1xf32, #tpu.memory_space<vmem>>, vector<8x1xf32>
      tpu.vector_store %arg18[%c0_33, %c0_34], %61 {strides = array<i32>} : memref<8x1xf32, #tpu.memory_space<vmem>>, vector<8x1xf32>,
    } else {
    }
    %c0 = arith.constant 0 : index
    %c0_2 = arith.constant 0 : index
    %5 = vector.load %arg16[%c0, %c0_2] : memref<8x128xf32, #tpu.memory_space<vmem>>, vector<8x128xf32>
    %c0_3 = arith.constant 0 : index
    %c0_4 = arith.constant 0 : index
    %6 = vector.load %arg8[%c0_3, %c0_4] : memref<128x128xf32, #tpu.memory_space<vmem>>, vector<128x128xf32>
    %cst = arith.constant dense<0.000000e+00> : vector<8x128xf32>
    %7 = tpu.matmul %5, %6, %cst {dimension_numbers = #tpu.dot_dimension_numbers<[1], [0], [0], [1], [0, 0, 1, 1], [], []>} : vector<8x128xf32>, vector<128x128xf32>, vector<8x128xf32> -> vector<8x128xf32>
    %c0_5 = arith.constant 0 : index
    %c0_6 = arith.constant 0 : index
    %8 = vector.load %arg9[%c0_5, %c0_6] : memref<1x128xf32, #tpu.memory_space<vmem>>, vector<1x128xf32>
    %9 = vector.broadcast %8 : vector<1x128xf32> to vector<8x128xf32>
    %10 = arith.addf %7, %9 : vector<8x128xf32>
    %c0_i32_7 = arith.constant 0 : i32
    %11 = arith.cmpi eq, %arg0, %c0_i32_7 : i32
    %12 = arith.extui %11 : i1 to i32
    %c0_i32_8 = arith.constant 0 : i32
    %13 = arith.cmpi ne, %12, %c0_i32_8 : i32
    scf.if %13 {
      %c0_10 = arith.constant 0 : index
      %c0_11 = arith.constant 0 : index
      %17 = vector.load %arg17[%c0_10, %c0_11] : memref<8x1xf32, #tpu.memory_space<vmem>>, vector<8x1xf32>
      %cst_12 = arith.constant dense<0xFF800000> : vector<8xf32>
      %18 = vector.multi_reduction <maximumf>, %10, %cst_12 [1] : vector<8x128xf32> to vector<8xf32>
      %19 = vector.shape_cast %18 : vector<8xf32> to vector<8x1xf32>
      %20 = arith.maximumf %17, %19 : vector<8x1xf32>
      %c0_13 = arith.constant 0 : index
      %c0_14 = arith.constant 0 : index
      %21 = vector.load %arg18[%c0_13, %c0_14] : memref<8x1xf32, #tpu.memory_space<vmem>>, vector<8x1xf32>
      %c0_15 = arith.constant 0 : index
      %c0_16 = arith.constant 0 : index
      %22 = vector.load %arg17[%c0_15, %c0_16] : memref<8x1xf32, #tpu.memory_space<vmem>>, vector<8x1xf32>
      %23 = arith.subf %22, %20 : vector<8x1xf32>
      %24 = math.exp %23 : vector<8x1xf32>
      %25 = arith.mulf %21, %24 : vector<8x1xf32>
      %26 = vector.broadcast %20 : vector<8x1xf32> to vector<8x128xf32>
      %27 = arith.subf %10, %26 : vector<8x128xf32>
      %28 = math.exp %27 : vector<8x128xf32>
      %cst_17 = arith.constant dense<0.000000e+00> : vector<8xf32>
      %29 = vector.multi_reduction <add>, %28, %cst_17 [1] : vector<8x128xf32> to vector<8xf32>
      %30 = vector.shape_cast %29 : vector<8xf32> to vector<8x1xf32>
      %31 = arith.addf %25, %30 : vector<8x1xf32>
      %c0_18 = arith.constant 0 : index
      %c0_19 = arith.constant 0 : index
      %32 = vector.load %arg18[%c0_18, %c0_19] : memref<8x1xf32, #tpu.memory_space<vmem>>, vector<8x1xf32>
      tpu.vector_store %arg18[%c0_18, %c0_19], %31 {strides = array<i32>} : memref<8x1xf32, #tpu.memory_space<vmem>>, vector<8x1xf32>,
      %c0_20 = arith.constant 0 : index
      %c0_21 = arith.constant 0 : index
      %33 = vector.load %arg17[%c0_20, %c0_21] : memref<8x1xf32, #tpu.memory_space<vmem>>, vector<8x1xf32>
      tpu.vector_store %arg17[%c0_20, %c0_21], %20 {strides = array<i32>} : memref<8x1xf32, #tpu.memory_space<vmem>>, vector<8x1xf32>,
      %c0_22 = arith.constant 0 : index
      %c0_23 = arith.constant 0 : index
      %34 = vector.load %arg10[%c0_22, %c0_23] : memref<128x256xf32, #tpu.memory_space<vmem>>, vector<128x256xf32>
      %cst_24 = arith.constant dense<0.000000e+00> : vector<8x256xf32>
      %35 = tpu.matmul %5, %34, %cst_24 {dimension_numbers = #tpu.dot_dimension_numbers<[1], [0], [0], [1], [0, 0, 1, 1], [], []>} : vector<8x128xf32>, vector<128x256xf32>, vector<8x256xf32> -> vector<8x256xf32>
      %c0_25 = arith.constant 0 : index
      %c0_26 = arith.constant 0 : index
      %36 = vector.load %arg11[%c0_25, %c0_26] : memref<1x256xf32, #tpu.memory_space<vmem>>, vector<1x256xf32>
      %37 = vector.broadcast %36 : vector<1x256xf32> to vector<8x256xf32>
      %38 = arith.addf %35, %37 : vector<8x256xf32>
      %39 = vector.extract_strided_slice %38 {offsets = [0, 128], sizes = [8, 128], strides = [1, 1]} : vector<8x256xf32> to vector<8x128xf32>
      %c0_27 = arith.constant 0 : index
      %c0_28 = arith.constant 0 : index
      %40 = vector.load %arg14[%c0_27, %c0_28] : memref<8x128xf32, #tpu.memory_space<vmem>>, vector<8x128xf32>
      tpu.vector_store %arg14[%c0_27, %c0_28], %39 {strides = array<i32>} : memref<8x128xf32, #tpu.memory_space<vmem>>, vector<8x128xf32>,
      %41 = vector.extract_strided_slice %38 {offsets = [0, 0], sizes = [8, 128], strides = [1, 1]} : vector<8x256xf32> to vector<8x128xf32>
      %c0_29 = arith.constant 0 : index
      %c0_30 = arith.constant 0 : index
      %42 = vector.load %arg15[%c0_29, %c0_30] : memref<8x128xf32, #tpu.memory_space<vmem>>, vector<8x128xf32>
      tpu.vector_store %arg15[%c0_29, %c0_30], %41 {strides = array<i32>} : memref<8x128xf32, #tpu.memory_space<vmem>>, vector<8x128xf32>,
    } else {
    }
    %c1_i32 = arith.constant 1 : i32
    %14 = arith.cmpi eq, %arg0, %c1_i32 : i32
    %15 = arith.extui %14 : i1 to i32
    %c0_i32_9 = arith.constant 0 : i32
    %16 = arith.cmpi ne, %15, %c0_i32_9 : i32
    scf.if %16 {
      %c0_10 = arith.constant 0 : index
      %c0_11 = arith.constant 0 : index
      %17 = vector.load %arg18[%c0_10, %c0_11] : memref<8x1xf32, #tpu.memory_space<vmem>>, vector<8x1xf32>
      %cst_12 = arith.constant 1.000000e+00 : f32
      %18 = vector.broadcast %cst_12 : f32 to vector<8x1xf32>
      %19 = arith.divf %18, %17 : vector<8x1xf32>
      %c0_13 = arith.constant 0 : index
      %c0_14 = arith.constant 0 : index
      %20 = vector.load %arg17[%c0_13, %c0_14] : memref<8x1xf32, #tpu.memory_space<vmem>>, vector<8x1xf32>
      %21 = vector.broadcast %20 : vector<8x1xf32> to vector<8x128xf32>
      %22 = arith.subf %10, %21 : vector<8x128xf32>
      %23 = math.exp %22 : vector<8x128xf32>
      %24 = vector.broadcast %19 : vector<8x1xf32> to vector<8x128xf32>
      %25 = arith.mulf %23, %24 : vector<8x128xf32>
      %c0_15 = arith.constant 0 : index
      %c0_16 = arith.constant 0 : index
      %26 = vector.load %arg12[%c0_15, %c0_16] : memref<8x128xf32, #tpu.memory_space<vmem>>, vector<8x128xf32>
      tpu.vector_store %arg12[%c0_15, %c0_16], %25 {strides = array<i32>} : memref<8x128xf32, #tpu.memory_space<vmem>>, vector<8x128xf32>,
      %c0_17 = arith.constant 0 : index
      %c0_18 = arith.constant 0 : index
      %27 = vector.load %arg3[%c0_17, %c0_18] : memref<8x1xf32, #tpu.memory_space<vmem>>, vector<8x1xf32>
      %28 = math.exp %27 : vector<8x1xf32>
      %29 = vector.broadcast %28 : vector<8x1xf32> to vector<8x128xf32>
      %30 = arith.mulf %29, %25 : vector<8x128xf32>
      %c0_19 = arith.constant 0 : index
      %c0_20 = arith.constant 0 : index
      %31 = vector.load %arg13[%c0_19, %c0_20] : memref<8x128xf32, #tpu.memory_space<vmem>>, vector<8x128xf32>
      tpu.vector_store %arg13[%c0_19, %c0_20], %30 {strides = array<i32>} : memref<8x128xf32, #tpu.memory_space<vmem>>, vector<8x128xf32>,
    } else {
    }
    return
  }
  func.func @transform_0(%arg0: i32, %arg1: i32) -> (i32, i32) {
    %c0_i32 = arith.constant 0 : i32
    %c0_i32_0 = arith.constant 0 : i32
    %c0_i32_1 = arith.constant 0 : i32
    return %c0_i32, %c0_i32_0 : i32, i32
  }
  func.func @transform_1(%arg0: i32, %arg1: i32) -> (i32, i32) {
    %c0_i32 = arith.constant 0 : i32
    %c0_i32_0 = arith.constant 0 : i32
    %c0_i32_1 = arith.constant 0 : i32
    return %c0_i32, %c0_i32_0 : i32, i32
  }
  func.func @transform_2(%arg0: i32, %arg1: i32) -> (i32, i32) {
    %c0_i32 = arith.constant 0 : i32
    %c0_i32_0 = arith.constant 0 : i32
    %c0_i32_1 = arith.constant 0 : i32
    return %c0_i32, %c0_i32_0 : i32, i32
  }
  func.func @transform_3(%arg0: i32, %arg1: i32) -> (i32, i32) {
    %c0_i32 = arith.constant 0 : i32
    %c0_i32_0 = arith.constant 0 : i32
    %c0_i32_1 = arith.constant 0 : i32
    return %c0_i32, %c0_i32_0 : i32, i32
  }
  func.func @transform_4(%arg0: i32, %arg1: i32) -> (i32, i32) {
    %c0_i32 = arith.constant 0 : i32
    %c0_i32_0 = arith.constant 0 : i32
    %c0_i32_1 = arith.constant 0 : i32
    return %c0_i32, %c0_i32_0 : i32, i32
  }
  func.func @transform_5(%arg0: i32, %arg1: i32) -> (i32, i32) {
    %c0_i32 = arith.constant 0 : i32
    %c0_i32_0 = arith.constant 0 : i32
    %c0_i32_1 = arith.constant 0 : i32
    return %c0_i32, %c0_i32_0 : i32, i32
  }
  func.func @transform_6(%arg0: i32, %arg1: i32) -> (i32, i32) {
    %c0_i32 = arith.constant 0 : i32
    %c0_i32_0 = arith.constant 0 : i32
    return %c0_i32, %arg1 : i32, i32
  }
  func.func @transform_7(%arg0: i32, %arg1: i32) -> (i32, i32) {
    %c0_i32 = arith.constant 0 : i32
    %c0_i32_0 = arith.constant 0 : i32
    return %c0_i32, %arg1 : i32, i32
  }
  func.func @transform_8(%arg0: i32, %arg1: i32) -> (i32, i32) {
    %c1_i32 = arith.constant 1 : i32
    %0 = arith.subi %c1_i32, %arg0 : i32
    %1 = arith.muli %arg1, %0 : i32
    %c1_i32_0 = arith.constant 1 : i32
    %2 = arith.muli %c1_i32_0, %arg0 : i32
    %3 = arith.addi %1, %2 : i32
    %c0_i32 = arith.constant 0 : i32
    %c0_i32_1 = arith.constant 0 : i32
    return %c0_i32, %3 : i32, i32
  }
  func.func @transform_9(%arg0: i32, %arg1: i32) -> (i32, i32) {
    %c1_i32 = arith.constant 1 : i32
    %0 = arith.subi %c1_i32, %arg0 : i32
    %1 = arith.muli %arg1, %0 : i32
    %c1_i32_0 = arith.constant 1 : i32
    %2 = arith.muli %c1_i32_0, %arg0 : i32
    %3 = arith.addi %1, %2 : i32
    %c0_i32 = arith.constant 0 : i32
    %c0_i32_1 = arith.constant 0 : i32
    return %c0_i32, %3 : i32, i32
  }
  func.func @transform_10(%arg0: i32, %arg1: i32) -> (i32, i32) {
    %0 = arith.muli %arg1, %arg0 : i32
    %c0_i32 = arith.constant 0 : i32
    %c0_i32_0 = arith.constant 0 : i32
    return %c0_i32, %0 : i32, i32
  }
  func.func @transform_11(%arg0: i32, %arg1: i32) -> (i32, i32) {
    %0 = arith.muli %arg1, %arg0 : i32
    %c0_i32 = arith.constant 0 : i32
    %c0_i32_0 = arith.constant 0 : i32
    return %c0_i32, %0 : i32, i32
  }
  func.func @transform_12(%arg0: i32, %arg1: i32) -> (i32, i32) {
    %c1_i32 = arith.constant 1 : i32
    %0 = arith.subi %c1_i32, %arg0 : i32
    %1 = arith.muli %arg1, %0 : i32
    %c1_i32_0 = arith.constant 1 : i32
    %2 = arith.muli %c1_i32_0, %arg0 : i32
    %3 = arith.addi %1, %2 : i32
    %c0_i32 = arith.constant 0 : i32
    %c0_i32_1 = arith.constant 0 : i32
    return %c0_i32, %3 : i32, i32
  }
  func.func @transform_13(%arg0: i32, %arg1: i32) -> (i32, i32) {
    %c1_i32 = arith.constant 1 : i32
    %0 = arith.subi %c1_i32, %arg0 : i32
    %1 = arith.muli %arg1, %0 : i32
    %c1_i32_0 = arith.constant 1 : i32
    %2 = arith.muli %c1_i32_0, %arg0 : i32
    %3 = arith.addi %1, %2 : i32
    %c0_i32 = arith.constant 0 : i32
    %c0_i32_1 = arith.constant 0 : i32
    return %c0_i32, %3 : i32, i32
  }
}

</mosaic_0001>

<bundles_post_ra>
// kernel: decoder_scvi_forward.1
= control target key start
LH: loop header
LB: loop body
LE: loop exit
PB: predicated region body
PF: predicated region fallthrough
CT: control target
= control target key end

     0   :  { %s2512_s0 = inlined_call_operand.vmem [shape: f32[8,16], index: 0, kind: input, shape index: {}]   ;;  %s2513_s1 = inlined_call_operand.vmem [shape: f32[8,1], index: 1, kind: input, shape index: {}]   ;;  %s2514_s2 = inlined_call_operand.vmem [shape: f32[16,128], index: 2, kind: input, shape index: {}]   ;;  %s2515_s3 = inlined_call_operand.vmem [shape: f32[1,128], index: 3, kind: input, shape index: {}]   ;;  %s2516_s4 = inlined_call_operand.vmem [shape: f32[1,128], index: 4, kind: input, shape index: {}]   ;;  %s2517_s5 = inlined_call_operand.vmem [shape: f32[1,128], index: 5, kind: input, shape index: {}]   ;;  %s2518_s6 = inlined_call_operand.hbm [shape: f32[128,256], index: 6, kind: input, shape index: {}]   ;;  %s2519_s7 = inlined_call_operand.vmem [shape: f32[1,256], index: 7, kind: input, shape index: {}]   ;;  %s2520_s8 = inlined_call_operand.hbm [shape: f32[128,512], index: 8, kind: input, shape index: {}]   ;;  %s2521_s9 = inlined_call_operand.vmem [shape: f32[1,512], index: 9, kind: input, shape index: {}]   ;;  %s2522_s10 = inlined_call_operand.hbm [shape: f32[8,256], index: 10, kind: output, shape index: {0}]   ;;  %s2523_s11 = inlined_call_operand.hbm [shape: f32[8,256], index: 11, kind: output, shape index: {1}]   ;;  %s2524_s12 = inlined_call_operand.hbm [shape: f32[8,256], index: 12, kind: output, shape index: {2}]   ;;  %s2525_s13 = inlined_call_operand.hbm [shape: f32[8,256], index: 13, kind: output, shape index: {3}]  }
   0x1   :  { %2548 = sst [smem:[#allocation36_spill]] %s2512_s0 }
   0x2   :  { %2549 = sst [smem:[#allocation37_spill]] %s2513_s1 }
   0x3   :  { %2550 = sst [smem:[#allocation38_spill]] %s2514_s2 }
   0x4   :  { %2551 = sst [smem:[#allocation39_spill]] %s2515_s3 }
   0x5   :  { %2552 = sst [smem:[#allocation40_spill]] %s2516_s4 }
   0x6   :  { %2553 = sst [smem:[#allocation41_spill]] %s2517_s5 }
   0x7   :  { %2554 = sst [smem:[#allocation42_spill]] %s2518_s6 }
   0x8   :  { %2555 = sst [smem:[#allocation43_spill]] %s2519_s7 }
   0x9   :  { %2556 = sst [smem:[#allocation44_spill]] %s2520_s8 }
   0xa   :  { %2557 = sst [smem:[#allocation45_spill]] %s2521_s9 }
   0xb   :  { %2558 = sst [smem:[#allocation46_spill]] %s2522_s10 }
   0xc   :  { %2559 = sst [smem:[#allocation47_spill]] %s2523_s11 }
   0xd   :  { %2560 = sst [smem:[#allocation48_spill]] %s2524_s12 }
   0xe   :  { %2561 = sst [smem:[#allocation49_spill]] %s2525_s13 }
   0xf   :  { %19 = vsyncpa [#allocation6], 0 }
  0x10   :  { %21 = vsyncpa [#allocation6 + $0x1], 0 }
  0x11   :  { %22 = vsyncpa [#allocation9], 0 }
  0x12   :  { %24 = vsyncpa [#allocation9 + $0x1], 0 }
  0x13   :  { %25 = vsyncpa [#allocation7], 0 }
  0x14   :  { %27 = vsyncpa [#allocation7 + $0x1], 0 }
  0x15   :  { %28 = vsyncpa [#allocation12], 0 }
  0x16   :  { %30 = vsyncpa [#allocation12 + $0x1], 0 }
  0x17   :  { %31 = vsyncpa [#allocation15], 0 }
  0x18   :  { %33 = vsyncpa [#allocation15 + $0x1], 0  ;;  %s1989_s25 = smov 0   ;;  %s1991_s26 = smov 0  }
  0x19   :  { %s1993_s27 = smov 0   ;;  %s1995_s28 = smov 0  }
  0x1a   :  { %s1997_s29 = smov 0   ;;  %s1999_s30 = smov 0  }
  0x1b   :  { %s2001_s14 = smov 0   ;;  %s2003_s15 = smov 0  }
  0x1c   :  { %s2005_s16 = smov 0   ;;  %s2007_s17 = smov 0  }
  0x1d   :  { %s2009_s18 = smov 0   ;;  %s2011_s19 = smov 0  }
  0x1e   :  { %s2013_s20 = smov 0   ;;  %s2015_s21 = smov 0  }
  0x1f LB: > { %2562 = sst [smem:[#allocation22_spill]] %s1854_s27  ;;  %s2058_s22 = sadd.s32 4294967295, %s1898_s21   ;;  %s1898_s21 = sphi %s2015_s21, %s39_s21   ;;  %s1894_s20 = sphi %s2013_s20, %s2640_s20   ;;  %s1890_s19 = sphi %s2011_s19, %s2639_s19   ;;  %s1886_s18 = sphi %s2009_s18, %s2632_s18   ;;  %s1882_s17 = sphi %s2007_s17, %s2631_s17   ;;  %s1878_s16 = sphi %s2005_s16, %s2630_s16   ;;  %s1874_s15 = sphi %s2003_s15, %s2629_s15   ;;  %s1870_s14 = sphi %s2001_s14, %s2628_s14   ;;  %s1866_s30 = sphi %s1999_s30, %s2627_s30   ;;  %s1862_s29 = sphi %s1997_s29, %s2638_s29   ;;  %s1858_s28 = sphi %s1995_s28, %s2625_s28   ;;  %s1854_s27 = sphi %s1993_s27, %s2624_s27   ;;  %s1850_s26 = sphi %s1991_s26, %s2637_s26   ;;  %s1846_s25 = sphi %s1989_s25, %s2636_s25  }
  0x20   : > { %2563 = sst [smem:[#allocation23_spill]] %s1858_s28  ;;  %s48_s23 = sadd.s32 1, %s1890_s19 }
  0x21   : > { %2564 = sst [smem:[#allocation24_spill]] %s1862_s29  ;;  %p2061_p0 = scmp.ge.s32.totalorder %s48_s23, 2 }
  0x22   : > { %2565 = sst [smem:[#allocation25_spill]] %s1866_s30  ;;  %s184_s13 = sadd.s32 1, %s1878_s16 }
  0x23   : > { %2566 = sst [smem:[#allocation26_spill]] %s1874_s15  ;;  %p191_p1 = scmp.ne.s32.totalorder %s1878_s16, %s1874_s15 }
  0x24   : > { %2567 = sst [smem:[#allocation27_spill]] %s1878_s16  ;;  %p192_p2 = scmp.eq.s32.totalorder %s1898_s21, 0 }
  0x25   : > { %2568 = sst [smem:[#allocation28_spill]] %s1886_s18  ;;  %s2642_s23 = smov (%p2061_p0, %s48_s23), 0 }
  0x26   : > { %2569 = sst [smem:[#allocation29_spill]] %s1890_s19  ;;  %p2075_p3 = por %p192_p2, %p191_p1 }
  0x27   : > { %2570 = sst [smem:[#allocation30_spill]] %s1894_s20  ;;  %p197_p4 = scmp.ne.s32.totalorder %s1874_s15, %s1870_s14 }
  0x28   : > { %2572 = sst [smem:[#allocation31_spill]] %s2642_s23  ;;  %s181_s10 = ssub.s32 %s1890_s19, %s2642_s23 }
  0x29   : > { %p198_p5 = scmp.eq.s32.totalorder %s2058_s22, 0  ;;  %p182_p6 = scmp.eq.s32.totalorder %s181_s10, 0 }
  0x2a   : > { %p2531_p8 = scmp.lt.s32.totalorder %s1898_s21, 4  ;;  %s449_s5 = sand.u32 1, %s1878_s16  }
  0x2b   : > { %p2085_p7 = por %p198_p5, %p197_p4  ;;  %s1337_s4 = sshll.u32 %s1890_s19, 7 }
  0x2c   : > { %s2091_s1 = scalar_select %p182_p6, %s1878_s16, %s184_s13  }
  0x2d   : > { %s1336_s3 = sshll.u32 %s449_s5, 7  ;;  %s2576_s6 = sld [smem:[#allocation42_spill]] }
  0x2e   : > { %2575 = sst [smem:[#allocation32_spill]] %s2091_s1  ;;  %s453_s7 = scalar_lea.vmem [#allocation5], %s1336_s3 }
  0x2f   : > { %s459_s14 = sshll.u32 %s453_s7, 4  ;;  %p2102_p9 = pnand %p2531_p8, %p2075_p3  ;;  %s460_s14 = int_to_ptr.vmem [resolvable:$true] %s459_s14 }
  0x30   : > { %p1341_p10 = scmp.ge.s32.totalorder %s1898_s21, 1  ;;  %s450_s13 = scalar_lea.sflag [#allocation6], %s449_s5 }
  0x31   : > { %p1606_p11 = pneg %p2102_p9  ;;  %s1617_s1 = scalar_lea.vmem %s460_s14, 2048 }
  0x32   : > { %p1618_p12 = scmp.ne.s32.totalorder %s460_s14, %s1617_s1  ;;  %s1900_s0 = smov [#allocation5]  }
  0x33   : > { %s458_s9 = scalar_lea.hbm %s2576_s6, %s1337_s4  ;;  %s1622_s2 = sshll.u32 %s1900_s0, 4  ;;  %s1623_s2 = int_to_ptr.vmem [resolvable:$false] %s1622_s2 }
  0x34   : > { %p1620_p13 = pnand %p1618_p12, %p1606_p11  ;;  %s1624_s3 = scalar_lea.vmem %s1623_s2, 4096 }
  0x35   : > { %p1625_p4 = scmp.lt.s32.totalorder %s460_s14, %s1623_s2  ;;  %p1626_p6 = scmp.lt.s32.totalorder %s1624_s3, %s1617_s1 }
  0x36   : > { %p1621_p1 = pneg %p1620_p13 }
  0x37   : > { %p1627_p3 = por %p1626_p6, %p1625_p4 }
  0x39   : > { %p1628_p8 = pnand %p1627_p3, %p1621_p1 }
  0x3b   : > { %1631 = shalt.err (!%p1628_p8)
}
  0x3c   : > { %s2532_s4 = smov 256   ;;  %s1902_s1 = smov 128  }
  0x3d   : > { %s1903_s5 = smov 8   ;;  %p511_p8 = scmp.lt.s32.totalorder %s1898_s21, 5 }
  0x3e   : > { %1445 = dma.hbm_to_vmem [thread:$0]  (!%p2102_p9), %s458_s9, 2048, %s460_s14, %s450_s13, %s2532_s4, %s1902_s1, %s1903_s5  }
  0x3f   : > { %p2115_p11 = pnand %p1341_p10, %p511_p8  ;;  %s51_s0 = sadd.s32 1, %s1894_s20 }
  0x40   : > { %s2644_s0 = smov (!%p2061_p0, %s51_s0), %s1894_s20  ;;  %s233_s9 = ssub.s32 1, %s1894_s20 }
  0x41   : > { %s242_s14 = sadd.s32 1, %s1866_s30  ;;  %p53_p9 = scmp.ge.s32.totalorder %s2644_s0, 2 }
  0x42   : > { %s234_s10 = smul.u32 %s1890_s19, %s233_s9  ;;  %p249_p12 = scmp.ne.s32.totalorder %s1866_s30, %s1862_s29 }
  0x43   : > { %p2536_p10 = scmp.ne.s32.totalorder %s1862_s29, %s1858_s28  ;;  %s2646_s0 = smov (%p53_p9, %s2644_s0), 0 }
  0x44   : > { %2579 = sst [smem:[#allocation33_spill]] %s2646_s0  ;;  %s235_s13 = sadd.s32 %s1894_s20, %s234_s10 }
  0x45   : > { %p2139_p13 = por %p249_p12, %p192_p2  ;;  %s236_s2 = ssub.s32 1, %s2646_s0 }
  0x46   : > { %p2149_p0 = por %p2536_p10, %p198_p5  ;;  %s237_s1 = smul.u32 %s236_s2, %s2642_s23 }
  0x47   : > { %s302_s5 = sadd.s32 1, %s1854_s27  ;;  %s297_s9 = smul.u32 %s1890_s19, %s1894_s20 }
  0x48   : > { %s2581_s3 = scalar_select %p2149_p0, 1, 0 }
  0x49   : > { %p312_p2 = scmp.ne.s32.totalorder %s1854_s27, %s1850_s26  ;;  %s238_s10 = sadd.s32 %s237_s1, %s2646_s0 }
  0x4a   : > { %s298_s4 = smul.u32 %s2646_s0, %s2642_s23  ;;  %s239_s12 = ssub.s32 %s235_s13, %s238_s10 }
  0x4b   : > { %p313_p1 = scmp.eq.s32.totalorder %s2058_s22, 3  ;;  %p240_p4 = scmp.eq.s32.totalorder %s239_s12, 0 }
  0x4c   : > { %s299_s6 = ssub.s32 %s297_s9, %s298_s4  ;;  %p318_p3 = scmp.ne.s32.totalorder %s1850_s26, %s1846_s25 }
  0x4d   : > { %p300_p5 = scmp.eq.s32.totalorder %s299_s6, 0  ;;  %p2163_p6 = por %p313_p1, %p312_p2 }
  0x4e   : > { %s2168_s2 = scalar_select %p240_p4, %s1866_s30, %s242_s14  }
  0x4f   : > { %s2171_s18 = scalar_select %p300_p5, %s1854_s27, %s302_s5  }
  0x50   : > { %2583 = sst [smem:[#allocation34_spill]] %s2168_s2  ;;  %s2585_s20 = sadd.s32 4294967294, %s1898_s21  }
  0x51   : > { %2584 = sst [smem:[#allocation35_spill]] %s2171_s18  ;;  %p319_p8 = scmp.eq.s32.totalorder %s2585_s20, 3 }
  0x52   : > { %p2180_p9 = por %p313_p1, %p249_p12  ;;  %s475_s4 = sand.u32 1, %s1866_s30  }
  0x53   : > { %p2185_p10 = por %p319_p8, %p318_p3  ;;  %p2588_p2 = scmp.ne.s32.totalorder %s1862_s29, %s1858_s28 }
  0x54   : > { %s2586_s1 = scalar_select %p2180_p9, 1, 0 }
  0x55   : > { %s2587_s6 = scalar_select %p2185_p10, 1, 0 }
  0x56   : > { %p2192_p0 = por %p319_p8, %p2588_p2  ;;  %s1338_s14 = sshll.u32 %s475_s4, 8 }
  0x57   : > { %s1367_s5 = sshll.u32 %s235_s13, 8  ;;  %s2590_s8 = sld [smem:[#allocation44_spill]] }
  0x58   : > { %s2589_s12 = scalar_select %p2192_p0, 1, 0 }
  0x59   : > { %s479_s0 = scalar_lea.vmem [#allocation8], %s1338_s14  ;;  %p2591_p12 = scmp.lt.s32.totalorder %s1898_s21, 4 }
  0x5a   : > { %s489_s23 = sshll.u32 %s479_s0, 4  ;;  %s476_s2 = scalar_lea.sflag [#allocation9], %s475_s4  ;;  %s490_s23 = int_to_ptr.vmem [resolvable:$true] %s489_s23 }
  0x5b   : > { %p2203_p1 = pnand %p2591_p12, %p2139_p13  ;;  %s1645_s30 = scalar_lea.vmem %s490_s23, 4096 }
  0x5c   : > { %p1646_p5 = scmp.ne.s32.totalorder %s490_s23, %s1645_s30  ;;  %s1904_s13 = smov [#allocation8]  }
  0x5d   : > { %s488_s20 = scalar_lea.hbm %s2590_s8, %s1367_s5  ;;  %p1634_p4 = pneg %p2203_p1 }
  0x5e   : > { %s1650_s9 = sshll.u32 %s1904_s13, 4  ;;  %s1651_s9 = int_to_ptr.vmem [resolvable:$false] %s1650_s9 }
  0x5f   : > { %p1648_p3 = pnand %p1646_p5, %p1634_p4  ;;  %s1652_s14 = scalar_lea.vmem %s1651_s9, 8192 }
  0x60   : > { %p1653_p2 = scmp.lt.s32.totalorder %s490_s23, %s1651_s9  ;;  %p1654_p0 = scmp.lt.s32.totalorder %s1652_s14, %s1645_s30 }
  0x61   : > { %p1649_p8 = pneg %p1648_p3 }
  0x62   : > { %p1655_p10 = por %p1654_p0, %p1653_p2 }
  0x64   : > { %p1656_p9 = pnand %p1655_p10, %p1649_p8 }
  0x66   : > { %1659 = shalt.err (!%p1656_p9)
}
  0x67   : > { %s1905_s0 = smov 512   ;;  %s1906_s24 = smov 16  }
  0x68   : > { %s2593_s4 = smov 256   ;;  %515 = sbr.rel (%p2115_p11) target bundleno = 1303 (0x517), region = 60 }
  0x69   : > { %1448 = dma.hbm_to_vmem [thread:$0]  (!%p2203_p1), %s488_s20, 4096, %s490_s23, %s476_s2, %s1905_s0, %s2593_s4, %s1906_s24  }
  0x6a   : > { %s517_s5 = sand.u32 (!%p2115_p11), 1, %s1874_s15  }
  0x6b   : > { %s1342_s10 = sshll.u32 (!%p2115_p11), %s517_s5, 7  ;;  %s518_s13 = scalar_lea.sflag (!%p2115_p11), [#allocation6], %s517_s5 }
  0x6c   : > { %s2215_s8 = scalar_lea.vmem (!%p2115_p11), [#allocation5], %s1342_s10 }
  0x6d   : > { %1821 = dma.done.wait (%p2085_p7), %s518_s13, 2048  }
  0x6e   : > { %1823 = vsyncadd (%p2085_p7), %s518_s13, 4294965248  ;;  %s2222_s30 = sand.u32 1, %s1862_s29   ;;  %p2594_p11 = scmp.ne.s32.totalorder %s2581_s3, 0 }
  0x6f   : > { %s1343_s19 = sshll.u32 %s2222_s30, 8  ;;  %s527_s23 = scalar_lea.sflag [#allocation9], %s2222_s30 }
  0x70   : > { %s2226_s7 = scalar_lea.vmem [#allocation8], %s1343_s19 }
  0x71   : > { %1825 = dma.done.wait (%p2594_p11), %s527_s23, 4096  }
  0x72   : > { %1827 = vsyncadd (%p2594_p11), %s527_s23, 4294963200  ;;  %s2595_s11 = sld [smem:[#allocation28_spill]]  ;;  %s2543_s2 = sand.u32 1, %s1850_s26  }
  0x73   : > { %s1346_s20 = sshll.u32 %s2222_s30, 3  ;;  %s2236_s9 = sshll.u32 %s2543_s2, 3 }
  0x74   : > { %p603_p7 = scmp.lt.s32.totalorder %s1882_s17, 1  ;;  %p630_p13 = scmp.eq.s32.totalorder %s1882_s17, 0 }
  0x75   : > { %s2596_s5 = sld [smem:[#allocation43_spill]]  ;;  %s581_s18 = scalar_lea.vmem [#allocation10], %s2236_s9 }
  0x76   : > { %s2242_s14 = scalar_select %p603_p7, %s1882_s17, 1 }
  0x77   : > { %s2597_s15 = sld [smem:[#allocation45_spill]]  ;;  %s2262_s27 = scalar_lea.vmem [#allocation13], %s1346_s20 }
  0x78   : > { %s610_s3 = ssub.s32 1, %s2595_s11  ;;  %p629_p10 = scmp.eq.s32.totalorder %s2595_s11, 0 }
  0x79   : > { %s611_s0 = smul.u32 %s1882_s17, %s610_s3  ;;  %s588_s3 = scalar_lea.vmem [#allocation11], %s2236_s9 }
  0x7a   : > { %p631_p0 = pnand %p630_p13, %p629_p10  ;;  %s2264_s28 = scalar_lea.vmem [#allocation14], %s1346_s20 }
  0x7b   : > { %s605_s10 = scalar_lea.vmem %s2596_s5, %s2242_s14  ;;  %s2251_s13 = sadd.s32 %s2595_s11, %s611_s0 }
  0x7c   : > { %s1348_s19 = sshll.u32 %s2251_s13, 1  ;;  %634 = sbr.rel (%p631_p0) target bundleno = 393 (0x189), region = 72 }
  0x7d   : > { %p614_p9 = scmp.lt.s32.totalorder %s1348_s19, 3  ;;  %s2598_s24 = sld [smem:[#allocation38_spill]] (!%p631_p0) }
  0x7e   : > { %s2599_s5 = sld [smem:[#allocation36_spill]] (!%p631_p0) }
  0x7f   : > { %s2648_s19 = smov (!%p614_p9, %s1348_s19), 3  ;;  %s2600_s0 = sld [smem:[#allocation39_spill]] (!%p631_p0) }
  0x80   : > { %s616_s29 = scalar_lea.vmem %s2597_s15, %s2648_s19  ;;  %s2601_s15 = sld [smem:[#allocation40_spill]] (!%p631_p0) }
  0x81   : > { %vm765_vm0 = vcmask 7168   ;;  %v1907_v1 = vmov 0.0   ;;  %v1908_v2 = vmov -1e+30   ;;  %vm1909_vm1 = vmmov 0   ;;  %s2602_s23 = sld [smem:[#allocation41_spill]] }
  0x82   : > { %1388 = vmatprep.subr.mxu0 %v1907_v1  ;;  %766 = vst.msk [vmem:[#allocation3] sm:$0xff] %vm765_vm0, %v1908_v2  ;;  %767 = vst.msk [vmem:[#allocation4] sm:$0xff] %vm765_vm0, %v1907_v1  ;;  %1392 = vmatprep.mubr.msk.f32.mxu0 %vm1909_vm1, %v1907_v1  ;;  %vm645_vm2 = vcmask 130048   ;;  %v719_v5 = vlaneseq }
  0x83   : > { %v637_v0 = vld [vmem:[%s2598_s24 + $0x8] sm:$0xff]  ;;  %v636_v3 = vld [vmem:[%s2598_s24] sm:$0xff] }
  0x84   : > { %1389 = vmatpush3.msra.mxu0 %v637_v0  ;;  %v635_v4 = vld [vmem:[%s2599_s5] sm:$0xff]  ;;  %v720_v6 = vshrl.u32 %v719_v5, 7 }
  0x85   : > { %1390 = vmatprep.subr.mxu0 %v1907_v1  ;;  %v1349_v7 = vld [vmem:[%s2600_s0] ss:$0 sm:$0xff] }
  0x86   : > { %1391 = vmatpush3.msra.mxu0 %v636_v3  ;;  %vm721_vm3 = vcmp.lt.s32.totalorder %v720_v6, 6  ;;  %v1352_v32 = vld [vmem:[%s2601_s15] ss:$0 sm:$0xff] }
  0x87   : > { %1393 = vmatmul.mubr.msk.f32.vlgmr.msra.gmra.mxu0 %vm645_vm2, %v635_v4  ;;  %v1351_v9 = vsel %vm721_vm3, 1.0, %v1907_v1  ;;  %v1353_v34 = vld [vmem:[%s2602_s23] ss:$0 sm:$0xff] }
 0x147   : > { %v715_v8 = vpop.f32.mrf.mxu0 }
 0x148   : > { %v716_v10 = vadd.f32 %v1349_v7, %v715_v8 }
 0x149   : > { %v1394_v11 = vpop.f32.mrf.mxu0 }
 0x14a   : > { %v724_v12 = vmul.f32 %v1351_v9, %v716_v10 }
 0x14c   : > { %v725_v13 = vrot.slane %v724_v12, 4 }
 0x14e   : > { %v726_v14 = vadd.f32 %v725_v13, %v724_v12 }
 0x150   : > { %v727_v15 = vrot.slane %v726_v14, 2 }
 0x152   : > { %v728_v16 = vadd.f32 %v727_v15, %v726_v14 }
 0x154   : > { %v729_v17 = vrot.slane %v728_v16, 1 }
 0x156   : > { %v730_v18 = vadd.f32 %v729_v17, %v728_v16 }
 0x158   : > { %v732_v19 = vmul.f32 0.16666667, %v730_v18 }
 0x15a   : > { %v733_v20 = vsub.f32 %v716_v10, %v732_v19 }
 0x15c   : > { %v734_v21 = vmul.f32 %v733_v20, %v733_v20 }
 0x15e   : > { %v735_v22 = vmul.f32 %v1351_v9, %v734_v21 }
 0x160   : > { %v736_v23 = vrot.slane %v735_v22, 4 }
 0x162   : > { %v737_v24 = vadd.f32 %v736_v23, %v735_v22 }
 0x164   : > { %v738_v25 = vrot.slane %v737_v24, 2 }
 0x166   : > { %v739_v26 = vadd.f32 %v738_v25, %v737_v24 }
 0x168   : > { %v740_v27 = vrot.slane %v739_v26, 1 }
 0x16a   : > { %v741_v28 = vadd.f32 %v740_v27, %v739_v26 }
 0x16c   : > { %v742_v29 = vmul.f32 0.16666667, %v741_v28 }
 0x16e   : > { %v743_v30 = vadd.f32 0.001, %v742_v29 }
 0x170   : > { %1589 = vrsqrt.f32 %v743_v30 }
 0x17d   : > { %v1590_v31 = vpop.eup %1589 }
 0x17e   : > { %v745_v33 = vmul.f32 %v1590_v31, %v733_v20 }
 0x180   : > { %v753_v35 = vmul.f32 %v1352_v32, %v745_v33 }
 0x182   : > { %v761_v36 = vadd.f32 %v1353_v34, %v753_v35 }
 0x184   : > { %v762_v37 = vmax.f32 %v761_v36, 0.0 }
 0x186   : > { %v763_v38 = vmul.f32 %v1351_v9, %v762_v37 }
 0x188   : > { %764 = vst [vmem:[#allocation2] sm:$0xff] %v763_v38 }
 0x189 PF: > { %v784_v39 = vld [vmem:[%s2215_s8 + $0x78] sm:$0xff]  ;;  %v1910_v40 = vmov 0.0   ;;  %v783_v41 = vld [vmem:[%s2215_s8 + $0x70] sm:$0xff]  ;;  %vm1911_vm4 = vmmov 0   ;;  %v782_v42 = vld [vmem:[%s2215_s8 + $0x68] sm:$0xff]  ;;  %s2604_s2 = sld [smem:[#allocation28_spill]] }
 0x18a   : > { %1395 = vmatprep.subr.mxu0 %v1910_v40  ;;  %1427 = vmatprep.mubr.msk.f32.mxu0 %vm1911_vm4, %v1910_v40  ;;  %v781_v43 = vld [vmem:[%s2215_s8 + $0x60] sm:$0xff]  ;;  %v780_v44 = vld [vmem:[%s2215_s8 + $0x58] sm:$0xff]  ;;  %v779_v45 = vld [vmem:[%s2215_s8 + $0x50] sm:$0xff] }
 0x18b   : > { %1396 = vmatpush3.msra.mxu0 %v784_v39  ;;  %v778_v46 = vld [vmem:[%s2215_s8 + $0x48] sm:$0xff]  ;;  %v777_v47 = vld [vmem:[%s2215_s8 + $0x40] sm:$0xff]  ;;  %v776_v48 = vld [vmem:[%s2215_s8 + $0x38] sm:$0xff] }
 0x18c   : > { %1397 = vmatprep.subr.mxu0 %v1910_v40  ;;  %v775_v49 = vld [vmem:[%s2215_s8 + $0x30] sm:$0xff]  ;;  %v774_v50 = vld [vmem:[%s2215_s8 + $0x28] sm:$0xff]  ;;  %v773_v51 = vld [vmem:[%s2215_s8 + $0x20] sm:$0xff] }
 0x18d   : > { %1398 = vmatpush3.msra.mxu0 %v783_v41  ;;  %v772_v52 = vld [vmem:[%s2215_s8 + $0x18] sm:$0xff]  ;;  %v771_v53 = vld [vmem:[%s2215_s8 + $0x10] sm:$0xff]  ;;  %v770_v54 = vld [vmem:[%s2215_s8 + $0x8] sm:$0xff] }
 0x18e   : > { %1399 = vmatprep.subr.mxu0 %v1910_v40  ;;  %v769_v55 = vld [vmem:[%s2215_s8] sm:$0xff]  ;;  %v1354_v57 = vld [vmem:[%s605_s10] ss:$0 sm:$0xff] }
 0x18f   : > { %1400 = vmatpush3.msra.mxu0 %v782_v42  ;;  %v2300_v56 = vld [vmem:[#allocation2] sm:$0xff]  ;;  %p1355_p12 = scmp.ne.s32.totalorder %s2604_s2, 0 }
 0x190   : > { %1401 = vmatprep.subr.mxu0 %v1910_v40 }
 0x191   : > { %1402 = vmatpush3.msra.mxu0 %v781_v43 }
 0x192   : > { %1403 = vmatprep.subr.mxu0 %v1910_v40 }
 0x193   : > { %1404 = vmatpush3.msra.mxu0 %v780_v44 }
 0x194   : > { %1405 = vmatprep.subr.mxu0 %v1910_v40 }
 0x195   : > { %1406 = vmatpush3.msra.mxu0 %v779_v45 }
 0x196   : > { %1407 = vmatprep.subr.mxu0 %v1910_v40 }
 0x197   : > { %1408 = vmatpush3.msra.mxu0 %v778_v46 }
 0x198   : > { %1409 = vmatprep.subr.mxu0 %v1910_v40 }
 0x199   : > { %1410 = vmatpush3.msra.mxu0 %v777_v47 }
 0x19a   : > { %1411 = vmatprep.subr.mxu0 %v1910_v40 }
 0x19b   : > { %1412 = vmatpush3.msra.mxu0 %v776_v48 }
 0x19c   : > { %1413 = vmatprep.subr.mxu0 %v1910_v40 }
 0x19d   : > { %1414 = vmatpush3.msra.mxu0 %v775_v49 }
 0x19e   : > { %1415 = vmatprep.subr.mxu0 %v1910_v40 }
 0x19f   : > { %1416 = vmatpush3.msra.mxu0 %v774_v50 }
 0x1a0   : > { %1417 = vmatprep.subr.mxu0 %v1910_v40 }
 0x1a1   : > { %1418 = vmatpush3.msra.mxu0 %v773_v51 }
 0x1a2   : > { %1419 = vmatprep.subr.mxu0 %v1910_v40 }
 0x1a3   : > { %1420 = vmatpush3.msra.mxu0 %v772_v52 }
 0x1a4   : > { %1421 = vmatprep.subr.mxu0 %v1910_v40 }
 0x1a5   : > { %1422 = vmatpush3.msra.mxu0 %v771_v53 }
 0x1a6   : > { %1423 = vmatprep.subr.mxu0 %v1910_v40 }
 0x1a7   : > { %1424 = vmatpush3.msra.mxu0 %v770_v54 }
 0x1a8   : > { %1425 = vmatprep.subr.mxu0 %v1910_v40 }
 0x1a9   : > { %1426 = vmatpush3.msra.mxu0 %v769_v55 }
 0x1aa   : > { %1428 = vmatmul.mubr.f32.vlgmr.msra.gmra.mxu0 %v2300_v56 }
 0x268   : > { %864 = sbr.rel (%p1355_p12) target bundleno = 1044 (0x414), region = 76 }
 0x26a   : > { %v858_v58 = vpop.f32.mrf.mxu0 }
 0x26b   : > { %v2308_v59 = vadd.f32 %v1354_v57, %v858_v58 }
 0x26c   : > { %v1429_v60 = vpop.f32.mrf.mxu0 }
 0x26d   : > { %866 = vmax.xlane.f32.xlu0 %v2308_v59  ;;  %v1912_v61 = vmov 0   ;;  %v919_v62 = vld [vmem:[%s2226_s7 + $0xf8] sm:$0xff]  ;;  %v918_v63 = vld [vmem:[%s2226_s7 + $0xf0] sm:$0xff]  ;;  %v917_v0 = vld [vmem:[%s2226_s7 + $0xe8] sm:$0xff]  ;;  %v1913_v2 = vmov 0.0   ;;  %vm885_vm5 = vcmask 7168   ;;  %v922_v35 = vlaneseq }
 0x26e   : > { %1591 = vset.pattern.permute.xlu0 %v1912_v61  ;;  %932 = vmatprep.subr.mxu0 %v919_v62  ;;  %v916_v1 = vld [vmem:[%s2226_s7 + $0xe0] sm:$0xff]  ;;  %v915_v3 = vld [vmem:[%s2226_s7 + $0xd8] sm:$0xff]  ;;  %v914_v4 = vld [vmem:[%s2226_s7 + $0xd0] sm:$0xff] }
 0x26f   : > { %996 = vmatprep.mubr.f32.mxu0 %v1913_v2  ;;  %933 = vmatpush1.msra.mxu0 %v918_v63  ;;  %v913_v5 = vld [vmem:[%s2226_s7 + $0xc8] sm:$0xff]  ;;  %v912_v6 = vld [vmem:[%s2226_s7 + $0xc0] sm:$0xff]  ;;  %v911_v7 = vld [vmem:[%s2226_s7 + $0xb8] sm:$0xff]  ;;  %v923_v36 = vshrl.u32 %v922_v35, 7 }
 0x270   : > { %934 = vmatprep.subr.mxu0 %v917_v0  ;;  %v910_v8 = vld [vmem:[%s2226_s7 + $0xb0] sm:$0xff]  ;;  %v909_v9 = vld [vmem:[%s2226_s7 + $0xa8] sm:$0xff]  ;;  %v908_v10 = vld [vmem:[%s2226_s7 + $0xa0] sm:$0xff] }
 0x271   : > { %935 = vmatpush1.msra.mxu0 %v916_v1  ;;  %v907_v11 = vld [vmem:[%s2226_s7 + $0x98] sm:$0xff]  ;;  %v906_v12 = vld [vmem:[%s2226_s7 + $0x90] sm:$0xff]  ;;  %v905_v13 = vld [vmem:[%s2226_s7 + $0x88] sm:$0xff]  ;;  %v924_v37 = vsub.s32 0, %v923_v36  ;;  %v928_v39 = vsub.s32 1, %v923_v36 }
 0x272   : > { %936 = vmatprep.subr.mxu0 %v915_v3  ;;  %v904_v14 = vld [vmem:[%s2226_s7 + $0x80] sm:$0xff]  ;;  %v903_v15 = vld [vmem:[%s2226_s7 + $0x78] sm:$0xff]  ;;  %v902_v16 = vld [vmem:[%s2226_s7 + $0x70] sm:$0xff] }
 0x273   : > { %937 = vmatpush1.msra.mxu0 %v914_v4  ;;  %v901_v17 = vld [vmem:[%s2226_s7 + $0x68] sm:$0xff]  ;;  %v900_v18 = vld [vmem:[%s2226_s7 + $0x60] sm:$0xff]  ;;  %v899_v19 = vld [vmem:[%s2226_s7 + $0x58] sm:$0xff] }
 0x274   : > { %938 = vmatprep.subr.mxu0 %v913_v5  ;;  %v898_v20 = vld [vmem:[%s2226_s7 + $0x50] sm:$0xff]  ;;  %v897_v21 = vld [vmem:[%s2226_s7 + $0x48] sm:$0xff]  ;;  %v896_v22 = vld [vmem:[%s2226_s7 + $0x40] sm:$0xff] }
 0x275   : > { %939 = vmatpush1.msra.mxu0 %v912_v6  ;;  %v895_v23 = vld [vmem:[%s2226_s7 + $0x38] sm:$0xff]  ;;  %v894_v24 = vld [vmem:[%s2226_s7 + $0x30] sm:$0xff]  ;;  %v893_v25 = vld [vmem:[%s2226_s7 + $0x28] sm:$0xff] }
 0x276   : > { %940 = vmatprep.subr.mxu0 %v911_v7  ;;  %v892_v26 = vld [vmem:[%s2226_s7 + $0x20] sm:$0xff]  ;;  %v891_v27 = vld [vmem:[%s2226_s7 + $0x18] sm:$0xff]  ;;  %v890_v28 = vld [vmem:[%s2226_s7 + $0x10] sm:$0xff] }
 0x277   : > { %941 = vmatpush1.msra.mxu0 %v910_v8  ;;  %v889_v29 = vld [vmem:[%s2226_s7 + $0x8] sm:$0xff]  ;;  %v888_v30 = vld [vmem:[%s2226_s7] sm:$0xff]  ;;  %v865_v31 = vld [vmem:[#allocation3] sm:$0xff] }
 0x278   : > { %942 = vmatprep.subr.mxu0 %v909_v9  ;;  %v920_v38 = vld [vmem:[%s616_s29] sm:$0x3]  ;;  %v869_v52 = vld [vmem:[#allocation4] sm:$0xff] }
 0x279   : > { %943 = vmatpush1.msra.mxu0 %v908_v10  ;;  %v925_v40 = vrot.slane %v920_v38, %v924_v37  ;;  %v929_v41 = vrot.slane %v920_v38, %v928_v39 }
 0x27a   : > { %944 = vmatprep.subr.mxu0 %v907_v11 }
 0x27b   : > { %945 = vmatpush1.msra.mxu0 %v906_v12 }
 0x27c   : > { %946 = vmatprep.subr.mxu0 %v905_v13 }
 0x27d   : > { %947 = vmatpush1.msra.mxu0 %v904_v14 }
 0x27e   : > { %948 = vmatprep.subr.mxu0 %v903_v15 }
 0x27f   : > { %949 = vmatpush1.msra.mxu0 %v902_v16 }
 0x280   : > { %950 = vmatprep.subr.mxu0 %v901_v17 }
 0x281   : > { %951 = vmatpush1.msra.mxu0 %v900_v18 }
 0x282   : > { %952 = vmatprep.subr.mxu0 %v899_v19 }
 0x283   : > { %953 = vmatpush1.msra.mxu0 %v898_v20 }
 0x284   : > { %954 = vmatprep.subr.mxu0 %v897_v21 }
 0x285   : > { %955 = vmatpush1.msra.mxu0 %v896_v22 }
 0x286   : > { %956 = vmatprep.subr.mxu0 %v895_v23 }
 0x287   : > { %957 = vmatpush1.msra.mxu0 %v894_v24 }
 0x288   : > { %958 = vmatprep.subr.mxu0 %v893_v25 }
 0x289   : > { %959 = vmatpush1.msra.mxu0 %v892_v26 }
 0x28a   : > { %960 = vmatprep.subr.mxu0 %v891_v27 }
 0x28b   : > { %961 = vmatpush1.msra.mxu0 %v890_v28 }
 0x28c   : > { %962 = vmatprep.subr.mxu0 %v889_v29 }
 0x28d   : > { %963 = vmatpush1.msra.mxu0 %v888_v30 }
 0x28e   : > { %997 = vmatmul.mubr.f32.vlgmr.msra.gmra.mxu0 %v2300_v56 }
 0x2f6   : > { %v867_v32 = vpop.xlane.xlu0 %866 }
 0x2f7   : > { %v868_v33 = vmax.f32 %v865_v31, %v867_v32 }
 0x2f9   : > { %v870_v34 = vsub.f32 %v865_v31, %v868_v33  ;;  %887 = vst.msk [vmem:[#allocation3] sm:$0xff] %vm885_vm5, %v868_v33  ;;  %876 = vperm.xlu0 %1591, %v868_v33  }
 0x2fb   : > { %v871_v50 = vmul.f32 1.442695, %v870_v34 }
 0x34e   : > { %v998_v42 = vpop.f32.mrf.mxu0 }
 0x34f   : > { %v999_v43 = vadd.f32 %v998_v42, %v925_v40 }
 0x350   : > { %v1000_v44 = vpop.f32.mrf.mxu0 }
 0x351   : > { %1004 = vst [vmem:[%s2264_s28] sm:$0xff] %v999_v43  ;;  %v1001_v45 = vadd.f32 %v1000_v44, %v929_v41 }
 0x353   : > { %1003 = vst [vmem:[%s2262_s27] sm:$0xff] %v1001_v45 }
 0x374   : > { %v877_v46 = vpop.permute.xlu0 %876 }
 0x375   : > { %v879_v47 = vsub.f32 %v2308_v59, %v877_v46 }
 0x377   : > { %v880_v48 = vmul.f32 1.442695, %v879_v47 }
 0x379   : > { %1592 = vpow2.f32 %v880_v48 }
 0x37a   : > { %1594 = vpow2.f32 %v871_v50 }
 0x386   : > { %v1593_v49 = vpop.eup %1592 }
 0x387   : > { %882 = vadd.xlane.f32.xlu1 %v1593_v49  ;;  %v1595_v51 = vpop.eup %1594 }
 0x388   : > { %v873_v53 = vmul.f32 %v1595_v51, %v869_v52 }
 0x410   : > { %v883_v54 = vpop.xlane.xlu1 %882 }
 0x411   : > { %v884_v55 = vadd.f32 %v883_v54, %v873_v53 }
 0x413   : > { %886 = vst.msk [vmem:[#allocation4] sm:$0xff] %vm885_vm5, %v884_v55 }
 0x414 PF: > { %s2606_s29 = sld [smem:[#allocation28_spill]] }
 0x41a   : > { %p1356_p1 = scmp.ne.s32.totalorder %s2606_s29, 1 }
 0x41b   : > { %s2607_s15 = sld [smem:[#allocation37_spill]] (!%p1356_p1) }
 0x41c   : > { %1008 = sbr.rel (%p1356_p1) target bundleno = 1206 (0x4b6), region = 80 }
 0x421   : > { %v1012_v56 = vld [vmem:[#allocation3] sm:$0xff]  ;;  %v1009_v57 = vld [vmem:[#allocation4] sm:$0xff]  ;;  %v1028_v58 = vld [vmem:[%s2607_s15] sm:$0xff]  ;;  %v1914_v60 = vmov 0  }
 0x422   : > { %1596 = vset.pattern.permute.xlu0 %v1914_v60  ;;  %1598 = vrcp.f32 %v1009_v57  ;;  %1597 = vset.pattern.permute.xlu1 %v1914_v60  ;;  %v1029_v61 = vmul.f32 1.442695, %v1028_v58 }
 0x423   : > { %1015 = vperm.xlu0 %1596, %v1012_v56  }
 0x424   : > { %1600 = vpow2.f32 %v1029_v61 }
 0x42f   : > { %v1599_v62 = vpop.eup %1598 }
 0x430   : > { %1023 = vperm.xlu0 %1596, %v1599_v62  }
 0x431   : > { %v1601_v63 = vpop.eup %1600 }
 0x432   : > { %1033 = vperm.xlu1 %1597, %v1601_v63  }
 0x49e   : > { %v1016_v0 = vpop.permute.xlu0 %1015 }
 0x49f   : > { %v1018_v1 = vsub.f32 %v2308_v59, %v1016_v0 }
 0x4a1   : > { %v1019_v2 = vmul.f32 1.442695, %v1018_v1 }
 0x4a3   : > { %1602 = vpow2.f32 %v1019_v2 }
 0x4ab   : > { %v1024_v4 = vpop.permute.xlu0 %1023 }
 0x4ad   : > { %v1034_v5 = vpop.permute.xlu1 %1033 }
 0x4b0   : > { %v1603_v3 = vpop.eup %1602 }
 0x4b1   : > { %v1026_v6 = vmul.f32 %v1603_v3, %v1024_v4 }
 0x4b3   : > { %1027 = vst [vmem:[%s581_s18] sm:$0xff] %v1026_v6  ;;  %v1036_v7 = vmul.f32 %v1034_v5, %v1026_v6 }
 0x4b5   : > { %1037 = vst [vmem:[%s588_s3] sm:$0xff] %v1036_v7 }
 0x4b6 PF: > { %s2608_s20 = sld [smem:[#allocation28_spill]]  ;;  %s1043_s5 = sand.u32 1, %s2058_s22  }
 0x4b7   : > { %s1082_s11 = sshll.u32 %s588_s3, 4  ;;  %s2609_s8 = sld [smem:[#allocation47_spill]]  ;;  %s1083_s11 = int_to_ptr.vmem [resolvable:$true] %s1082_s11 }
 0x4b8   : > { %s2375_s14 = scalar_lea.sflag [#allocation12], %s1043_s5  ;;  %s1660_s29 = scalar_lea.vmem %s1083_s11, 128 }
 0x4b9   : > { %p1661_p4 = scmp.ne.s32.totalorder %s1083_s11, %s1660_s29  ;;  %s1915_s10 = smov [#allocation11]  }
 0x4ba   : > { %s1664_s22 = sshll.u32 %s1915_s10, 4  ;;  %s1665_s22 = int_to_ptr.vmem [resolvable:$false] %s1664_s22 }
 0x4bb   : > { %p1662_p5 = pnand %p1661_p4, %p2163_p6  ;;  %p1667_p8 = scmp.lt.s32.totalorder %s1083_s11, %s1665_s22 }
 0x4bc   : > { %s1061_s23 = smul.u32 %s1882_s17, %s2608_s20  ;;  %s1666_s17 = scalar_lea.vmem %s1665_s22, 256 }
 0x4bd   : > { %p1663_p3 = pneg %p1662_p5  ;;  %p1668_p2 = scmp.lt.s32.totalorder %s1666_s17, %s1660_s29 }
 0x4be   : > { %s2369_s0 = sshll.u32 %s1061_s23, 7 }
 0x4bf   : > { %s1080_s7 = scalar_lea.hbm %s2609_s8, %s2369_s0  ;;  %p1669_p11 = por %p1668_p2, %p1667_p8 }
 0x4c1   : > { %p1670_p7 = pnand %p1669_p11, %p1663_p3 }
 0x4c3   : > { %1673 = shalt.err (!%p1670_p7)
}
 0x4c4   : > { %s1674_s3 = scalar_lea.hbm %s1080_s7, 128  ;;  %s1678_s20 = scalar_lea.hbm %s2609_s8, 256 }
 0x4c5   : > { %p1675_p10 = scmp.ne.s32.totalorder %s1080_s7, %s1674_s3  ;;  %p1679_p9 = scmp.lt.s32.totalorder %s1080_s7, %s2609_s8 }
 0x4c6   : > { %p1680_p12 = scmp.lt.s32.totalorder %s1678_s20, %s1674_s3 }
 0x4c7   : > { %p1676_p13 = pnand %p1675_p10, %p2163_p6 }
 0x4c8   : > { %p1681_p1 = por %p1680_p12, %p1679_p9 }
 0x4c9   : > { %p1677_p0 = pneg %p1676_p13 }
 0x4cb   : > { %p1682_p4 = pnand %p1681_p1, %p1677_p0 }
 0x4cd   : > { %1685 = shalt.err (!%p1682_p4)
}
 0x4ce   : > { %1435 = dma.vmem_to_hbm [thread:$0]  (%p2163_p6), %s1083_s11, 128, %s1080_s7, %s2375_s14  }
 0x4cf   : > { %s2610_s29 = sld [smem:[#allocation46_spill]]  ;;  %s1068_s17 = sshll.u32 %s581_s18, 4  ;;  %s1069_s17 = int_to_ptr.vmem [resolvable:$true] %s1068_s17 }
 0x4d0   : > { %s1363_s3 = sshll.u32 %s2251_s13, 7  ;;  %s2612_s19 = sand.u32 1, %s1850_s26  }
 0x4d1   : > { %s1039_s15 = scalar_lea.sflag [#allocation7], %s2612_s19  ;;  %s1686_s20 = scalar_lea.vmem %s1069_s17, 128 }
 0x4d2   : > { %p1687_p5 = scmp.ne.s32.totalorder %s1069_s17, %s1686_s20  ;;  %s1916_s5 = smov [#allocation10]  }
 0x4d3   : > { %s1690_s23 = sshll.u32 %s1916_s5, 4  ;;  %s1691_s23 = int_to_ptr.vmem [resolvable:$false] %s1690_s23 }
 0x4d4   : > { %p1688_p3 = pnand %p1687_p5, %p2163_p6  ;;  %s1692_s11 = scalar_lea.vmem %s1691_s23, 256 }
 0x4d5   : > { %s2611_s10 = smov %s2610_s29  ;;  %s2394_s22 = scalar_lea.hbm %s2610_s29, %s2369_s0 }
 0x4d6   : > { %p1689_p8 = pneg %p1688_p3  ;;  %p1693_p2 = scmp.lt.s32.totalorder %s1069_s17, %s1691_s23 }
 0x4d7   : > { %p1694_p11 = scmp.lt.s32.totalorder %s1692_s11, %s1686_s20 }
 0x4d9   : > { %p1695_p7 = por %p1694_p11, %p1693_p2 }
 0x4db   : > { %p1696_p10 = pnand %p1695_p7, %p1689_p8 }
 0x4dd   : > { %1699 = shalt.err (!%p1696_p10)
}
 0x4de   : > { %s1700_s18 = scalar_lea.hbm %s2394_s22, 128  ;;  %s1704_s7 = scalar_lea.hbm %s2611_s10, 256 }
 0x4df   : > { %p1701_p13 = scmp.ne.s32.totalorder %s2394_s22, %s1700_s18  ;;  %p1705_p12 = scmp.lt.s32.totalorder %s2394_s22, %s2611_s10 }
 0x4e0   : > { %p1706_p1 = scmp.lt.s32.totalorder %s1704_s7, %s1700_s18 }
 0x4e1   : > { %p1702_p0 = pnand %p1701_p13, %p2163_p6 }
 0x4e2   : > { %p1707_p4 = por %p1706_p1, %p1705_p12 }
 0x4e3   : > { %p1703_p9 = pneg %p1702_p0 }
 0x4e5   : > { %p1708_p5 = pnand %p1707_p4, %p1703_p9 }
 0x4e7   : > { %1711 = shalt.err (!%p1708_p5)
}
 0x4e8   : > { %1434 = dma.vmem_to_hbm [thread:$0]  (%p2163_p6), %s1069_s17, 128, %s2394_s22, %s1039_s15  }
 0x4e9   : > { %s2613_s20 = sld [smem:[#allocation48_spill]]  ;;  %s1098_s11 = sshll.u32 %s2262_s27, 4  ;;  %s1099_s11 = int_to_ptr.vmem [resolvable:$true] %s1098_s11 }
 0x4ea   : > { %s1712_s9 = scalar_lea.vmem %s1099_s11, 128  ;;  %p2615_p8 = scmp.ne.s32.totalorder %s2586_s1, 0 }
 0x4eb   : > { %p1713_p3 = scmp.ne.s32.totalorder %s1099_s11, %s1712_s9  ;;  %s1917_s18 = smov [#allocation13]  }
 0x4ec   : > { %s1716_s0 = sshll.u32 %s1917_s18, 4  ;;  %s1717_s0 = int_to_ptr.vmem [resolvable:$false] %s1716_s0 }
 0x4ed   : > { %p1714_p2 = pnand %p1713_p3, %p2615_p8  ;;  %s1718_s16 = scalar_lea.vmem %s1717_s0, 256 }
 0x4ee   : > { %p1719_p7 = scmp.lt.s32.totalorder %s1099_s11, %s1717_s0  ;;  %p1720_p10 = scmp.lt.s32.totalorder %s1718_s16, %s1712_s9 }
 0x4ef   : > { %s2614_s5 = smov %s2613_s20  ;;  %s1096_s23 = scalar_lea.hbm %s2613_s20, %s1363_s3 }
 0x4f0   : > { %p1715_p11 = pneg %p1714_p2  ;;  %p1721_p13 = por %p1720_p10, %p1719_p7 }
 0x4f2   : > { %p1722_p6 = pnand %p1721_p13, %p1715_p11 }
 0x4f4   : > { %1725 = shalt.err (!%p1722_p6)
}
 0x4f5   : > { %s1726_s22 = scalar_lea.hbm %s1096_s23, 128  ;;  %s1730_s15 = scalar_lea.hbm %s2614_s5, 256 }
 0x4f6   : > { %p1727_p0 = scmp.ne.s32.totalorder %s1096_s23, %s1726_s22  ;;  %p1731_p1 = scmp.lt.s32.totalorder %s1096_s23, %s2614_s5 }
 0x4f7   : > { %p1732_p4 = scmp.lt.s32.totalorder %s1730_s15, %s1726_s22 }
 0x4f8   : > { %p1728_p9 = pnand %p1727_p0, %p2615_p8 }
 0x4f9   : > { %p1733_p5 = por %p1732_p4, %p1731_p1 }
 0x4fa   : > { %p1729_p12 = pneg %p1728_p9 }
 0x4fc   : > { %p1734_p3 = pnand %p1733_p5, %p1729_p12 }
 0x4fe   : > { %1737 = shalt.err (!%p1734_p3)
}
 0x4ff   : > { %1436 = dma.vmem_to_hbm [thread:$0]  (%p2615_p8), %s1099_s11, 128, %s1096_s23, %s2375_s14  }
 0x500   : > { %s2616_s19 = sld [smem:[#allocation49_spill]]  ;;  %s1114_s18 = sshll.u32 %s2264_s28, 4  ;;  %s1115_s18 = int_to_ptr.vmem [resolvable:$true] %s1114_s18 }
 0x501   : > { %s1054_s0 = scalar_lea.sflag [#allocation15], %s2222_s30  ;;  %s1738_s16 = scalar_lea.vmem %s1115_s18, 128 }
 0x502   : > { %p1739_p2 = scmp.ne.s32.totalorder %s1115_s18, %s1738_s16  ;;  %s1918_s22 = smov [#allocation14]  }
 0x503   : > { %s1742_s27 = sshll.u32 %s1918_s22, 4  ;;  %s1743_s27 = int_to_ptr.vmem [resolvable:$false] %s1742_s27 }
 0x504   : > { %p1740_p11 = pnand %p1739_p2, %p2615_p8  ;;  %s1744_s17 = scalar_lea.vmem %s1743_s27, 256 }
 0x505   : > { %p1745_p10 = scmp.lt.s32.totalorder %s1115_s18, %s1743_s27  ;;  %p1746_p13 = scmp.lt.s32.totalorder %s1744_s17, %s1738_s16 }
 0x506   : > { %s2617_s9 = smov %s2616_s19  ;;  %s1112_s20 = scalar_lea.hbm %s2616_s19, %s1363_s3 }
 0x507   : > { %p1741_p7 = pneg %p1740_p11  ;;  %p1747_p6 = por %p1746_p13, %p1745_p10 }
 0x509   : > { %p1748_p0 = pnand %p1747_p6, %p1741_p7 }
 0x50b   : > { %1751 = shalt.err (!%p1748_p0)
}
 0x50c   : > { %s1752_s13 = scalar_lea.hbm %s1112_s20, 128  ;;  %s1756_s14 = scalar_lea.hbm %s2617_s9, 256 }
 0x50d   : > { %p1753_p9 = scmp.ne.s32.totalorder %s1112_s20, %s1752_s13  ;;  %p1757_p4 = scmp.lt.s32.totalorder %s1112_s20, %s2617_s9 }
 0x50e   : > { %p1758_p5 = scmp.lt.s32.totalorder %s1756_s14, %s1752_s13 }
 0x50f   : > { %p1754_p12 = pnand %p1753_p9, %p2615_p8 }
 0x510   : > { %p1759_p3 = por %p1758_p5, %p1757_p4 }
 0x511   : > { %p1755_p1 = pneg %p1754_p12 }
 0x513   : > { %p1760_p2 = pnand %p1759_p3, %p1755_p1 }
 0x515   : > { %1763 = shalt.err (!%p1760_p2)
}
 0x516   : > { %1437 = dma.vmem_to_hbm [thread:$0]  (%p2615_p8), %s1115_s18, 128, %s1112_s20, %s1054_s0  }
 0x517 PF: > { %p1463_p11 = scmp.ge.s32.totalorder %s1898_s21, 2  ;;  %s1126_s11 = sand.u32 1, %s1846_s25  }
 0x518   : > { %p2618_p7 = scmp.ne.s32.totalorder %s2587_s6, 0  ;;  %s1127_s15 = scalar_lea.sflag [#allocation7], %s1126_s11 }
 0x51a   : > { %p1450_p10 = pnand %p1463_p11, %p2618_p7 }
 0x51c   : > { %p1451_p13 = pneg %p1450_p10 }
 0x51e   : > { %1829 = dma.done.wait (%p1451_p13), %s1127_s15, 128  }
 0x51f   : > { %1831 = vsyncadd (%p1451_p13), %s1127_s15, 4294967168  ;;  %s2619_s7 = sadd.s32 4294967294, %s1898_s21  }
 0x520   : > { %s1135_s4 = sand.u32 1, %s2619_s7  }
 0x521   : > { %s1136_s2 = scalar_lea.sflag [#allocation12], %s1135_s4 }
 0x522   : > { %1833 = dma.done.wait (%p1451_p13), %s1136_s2, 128  }
 0x523   : > { %1835 = vsyncadd (%p1451_p13), %s1136_s2, 4294967168  ;;  %p2620_p8 = scmp.ne.s32.totalorder %s2589_s12, 0 }
 0x525   : > { %p1456_p6 = pnand %p1463_p11, %p2620_p8 }
 0x527   : > { %p1457_p0 = pneg %p1456_p6 }
 0x529   : > { %1837 = dma.done.wait (%p1457_p0), %s1136_s2, 128  }
 0x52a   : > { %1839 = vsyncadd (%p1457_p0), %s1136_s2, 4294967168  ;;  %s2621_s1 = sld [smem:[#allocation23_spill]] }
 0x530   : > { %s1153_s25 = sand.u32 1, %s2621_s1  }
 0x531   : > { %s1154_s6 = scalar_lea.sflag [#allocation15], %s1153_s25 }
 0x532   : > { %1841 = dma.done.wait (%p1457_p0), %s1154_s6, 128  }
 0x533   : > { %1843 = vsyncadd (%p1457_p0), %s1154_s6, 4294967168  ;;  %s39_s21 = sadd.s32 1, %s1898_s21   ;;  %s2623_s19 = sld [smem:[#allocation22_spill]] }
 0x534   : > { %p2465_p9 = scmp.ge.s32.totalorder %s39_s21, 6   ;;  %s2624_s27 = sld [smem:[#allocation35_spill]] }
 0x535   : > { %s2625_s28 = sld [smem:[#allocation24_spill]]  ;;  %s2636_s25 = smov %s1850_s26 }
 0x536   : > { %s2626_s12 = sld [smem:[#allocation25_spill]] }
 0x537   : > { %s2627_s30 = sld [smem:[#allocation34_spill]] }
 0x538   : > { %s2628_s14 = sld [smem:[#allocation26_spill]] }
 0x539   : > { %s2629_s15 = sld [smem:[#allocation27_spill]]  ;;  %s2637_s26 = smov %s2623_s19 }
 0x53a   : > { %s2630_s16 = sld [smem:[#allocation32_spill]] }
 0x53b   : > { %s2631_s17 = sld [smem:[#allocation29_spill]] }
 0x53c   : > { %s2632_s18 = sld [smem:[#allocation30_spill]]  ;;  %s2638_s29 = smov %s2626_s12 }
 0x53d   : > { %s2633_s20 = sld [smem:[#allocation31_spill]] }
 0x53e   : > { %s2634_s0 = sld [smem:[#allocation33_spill]] }
 0x540   :  { %38 = sbr.rel (!%p2465_p9) target bundleno = 31 (0x1f), region = 185 }
 0x543   : > { %s2639_s19 = smov %s2633_s20 }
 0x544   : > { %s2640_s20 = smov %s2634_s0 }
 0x545   :  { %1159 = vsyncpa [#allocation6], 1 }
 0x546   :  { %1161 = vsyncpa [#allocation6 + $0x1], 1 }
 0x547   :  { %1162 = vsyncpa [#allocation9], 1 }
 0x548   :  { %1164 = vsyncpa [#allocation9 + $0x1], 1 }
 0x549   :  { %1165 = vsyncpa [#allocation7], 1 }
 0x54a   :  { %1167 = vsyncpa [#allocation7 + $0x1], 1 }
 0x54b   :  { %1168 = vsyncpa [#allocation12], 1 }
 0x54c   :  { %1170 = vsyncpa [#allocation12 + $0x1], 1 }
 0x54d   :  { %1171 = vsyncpa [#allocation15], 1 }
 0x54e   :  { %1173 = vsyncpa [#allocation15 + $0x1], 1 }

</bundles_post_ra>
